<compile_context>
chip_gen: v6e
topology: v6e:2x2x1
jax: 0.10.0
libtpu: 0.0.40
codegen_flags: <defaults>
</compile_context>

<pallas_src>
import functools

import jax
import jax.numpy as jnp
from jax import lax
from jax.experimental import pallas as pl
from jax.experimental.pallas import tpu as pltpu


def _make_kernel(num_heads: int, head_dim: int, eps: float = 1e-5):
    scale = 1.0 / (head_dim ** 0.5)
    E = num_heads * head_dim

    def kernel(x_ref,                     # (1, L, E) f32
               wqkv_ref, bqkv_ref,        # in_proj  (E, 3E) bf16, (1, 3E) f32
               wo_h_ref, bo_ref,          # out_proj (H, d, E) bf16, (1, E) f32
               ln1g_ref, ln1b_ref,        # layer_norm1 (1, E) f32
               w1_ref, fb1_ref,           # ffn linear1 (E, 4E) bf16, (1, 4E) f32
               w2_ref, fb2_ref,           # ffn linear2 (4E, E) bf16, (1, E) f32
               ln2g_ref, ln2b_ref,        # layer_norm2 (1, E) f32
               o_ref):                    # (1, L, E) f32
        x = x_ref[0]                      # (L, E) f32, one batch element
        d = head_dim
        x_bf = x.astype(jnp.bfloat16)

        # ---- self-attention: single fused QKV projection (bf16 MXU, f32 acc) ----
        qkv = jnp.dot(x_bf, wqkv_ref[...],
                      preferred_element_type=jnp.float32) + bqkv_ref[...]   # (L, 3E) f32

        # Head split via static lane slices stacked on a new leading (batch) axis.
        # All subsequent matmuls are batched over heads (no per-head MXU calls,
        # no lane-concatenate on the way out).
        q_heads, k_heads, v_heads = [], [], []
        for h in range(num_heads):
            q_heads.append(qkv[:, h * d:(h + 1) * d])
            k_heads.append(qkv[:, E + h * d:E + (h + 1) * d])
            v_heads.append(qkv[:, 2 * E + h * d:2 * E + (h + 1) * d])
        qh = jnp.stack(q_heads, axis=0) * scale          # (H, L, d) f32
        kh = jnp.stack(k_heads, axis=0)                  # (H, L, d) f32
        vh = jnp.stack(v_heads, axis=0)                  # (H, L, d) f32

        # scores / softmax / context, batched over heads
        s = jnp.einsum('hqd,hkd->hqk',
                       qh.astype(jnp.bfloat16), kh.astype(jnp.bfloat16),
                       preferred_element_type=jnp.float32)                  # (H, L, L)
        s = s - jnp.max(s, axis=-1, keepdims=True)
        p = jnp.exp(s)
        p = p * pl.reciprocal(jnp.sum(p, axis=-1, keepdims=True), approx=True)
        ctx = jnp.einsum('hqk,hkd->hqd',
                         p.astype(jnp.bfloat16), vh.astype(jnp.bfloat16),
                         preferred_element_type=jnp.float32)                # (H, L, d)

        # output projection: per-head (d, E) weight slabs; summing over heads is
        # mathematically identical to concat(heads) @ out_proj.weight.T
        attn = jnp.einsum('hqd,hde->hqe',
                          ctx.astype(jnp.bfloat16), wo_h_ref[...],
                          preferred_element_type=jnp.float32)               # (H, L, E)
        attn = jnp.sum(attn, axis=0) + bo_ref[...]                          # (L, E)

        # dropout1 -> identity (eval)
        # ---- residual + layer_norm1 (f32 statistics) ----
        x1 = x + attn
        mu1 = jnp.mean(x1, axis=-1, keepdims=True)
        xc1 = x1 - mu1
        var1 = jnp.mean(xc1 * xc1, axis=-1, keepdims=True)
        x1 = xc1 * lax.rsqrt(var1 + eps) * ln1g_ref[...] + ln1b_ref[...]

        # ---- feed forward (bf16 MXU, f32 acc) ----
        h1 = jnp.dot(x1.astype(jnp.bfloat16), w1_ref[...],
                     preferred_element_type=jnp.float32) + fb1_ref[...]
        h1 = jnp.maximum(h1, 0.0)
        h2 = jnp.dot(h1.astype(jnp.bfloat16), w2_ref[...],
                     preferred_element_type=jnp.float32) + fb2_ref[...]

        # dropout2 -> identity (eval)
        # ---- residual + layer_norm2 ----
        x2 = x1 + h2
        mu2 = jnp.mean(x2, axis=-1, keepdims=True)
        xc2 = x2 - mu2
        var2 = jnp.mean(xc2 * xc2, axis=-1, keepdims=True)
        o_ref[0] = xc2 * lax.rsqrt(var2 + eps) * ln2g_ref[...] + ln2b_ref[...]

    return kernel


def _vmem_limit_bytes(L, E, H):
    """Explicit scoped-VMEM budget: bf16 weights (double-buffered by the pipeline),
    f32 biases/LN params/IO tiles, plus in-kernel f32 activations. Floored at the
    v6e/v7x default (32 MiB) and capped below v7x physical VMEM."""
    d = E // H
    bf16, f32 = 2, 4
    weights_bf16 = E * 3 * E + H * d * E + E * 4 * E + 4 * E * E
    params_f32 = 3 * E + E + 4 * E + E + 4 * E
    acts_f32 = (L * 3 * E + 3 * H * L * d + 2 * H * L * L
                + H * L * E + L * 4 * E + 8 * L * E)
    io_f32 = 2 * L * E
    est = 2 * (weights_bf16 * bf16 + params_f32 * f32 + io_f32 * f32) + acts_f32 * f32
    return int(min(max(2 * est, 32 << 20), 56 << 20))


def transformer_block(x_lne, params, num_heads):
    """x_lne: (L, N, E) float32, PyTorch MultiheadAttention layout."""
    L, N, E = x_lne.shape
    head_dim = E // num_heads
    # TODO(synk): keep activations batch-major across layers to drop these transposes.
    x = jnp.transpose(x_lne, (1, 0, 2))     # (N, L, E) batch-major for the kernel

    kernel = _make_kernel(num_heads, head_dim)

    def full(shape):
        nd = len(shape)
        return pl.BlockSpec(shape, lambda b, _nd=nd: (0,) * _nd)

    in_specs = [
        pl.BlockSpec((1, L, E), lambda b: (b, 0, 0)),        # x
        full((E, 3 * E)), full((1, 3 * E)),                  # in_proj  (bf16 W)
        full((num_heads, head_dim, E)), full((1, E)),        # out_proj (per-head bf16 W)
        full((1, E)), full((1, E)),                          # layer_norm1
        full((E, 4 * E)), full((1, 4 * E)),                  # ffn linear1 (bf16 W)
        full((4 * E, E)), full((1, E)),                      # ffn linear2 (bf16 W)
        full((1, E)), full((1, E)),                          # layer_norm2
    ]

    out = pl.pallas_call(
        kernel,
        out_shape=jax.ShapeDtypeStruct((N, L, E), jnp.float32),
        grid=(N,),
        in_specs=in_specs,
        out_specs=pl.BlockSpec((1, L, E), lambda b: (b, 0, 0)),
        compiler_params=pltpu.CompilerParams(
            dimension_semantics=("parallel",),
            vmem_limit_bytes=_vmem_limit_bytes(L, E, num_heads)),
    )(x, *params)

    return jnp.transpose(out, (1, 0, 2))    # back to (L, N, E)


def init_params(key, hidden_size, num_heads):
    """Deterministic synthetic parameters matching nn.MultiheadAttention /
    nn.LayerNorm / nn.Linear shapes. Matmul weights are handed to the kernel
    pre-transposed (in_features, out_features) and cast to bf16; the out-proj
    weight is additionally split per head into (H, head_dim, E)."""
    E = hidden_size
    d = E // num_heads
    ks = jax.random.split(key, 6)
    s = 0.02
    wqkv = jax.random.normal(ks[0], (3 * E, E), jnp.float32) * s   # in_proj_weight
    bqkv = jnp.zeros((1, 3 * E), jnp.float32)
    wo = jax.random.normal(ks[1], (E, E), jnp.float32) * s         # out_proj.weight
    bo = jnp.zeros((1, E), jnp.float32)
    ln1g = jnp.ones((1, E), jnp.float32)
    ln1b = jnp.zeros((1, E), jnp.float32)
    w1 = jax.random.normal(ks[2], (4 * E, E), jnp.float32) * s     # Linear(E, 4E).weight
    fb1 = jax.random.normal(ks[3], (1, 4 * E), jnp.float32) * s
    w2 = jax.random.normal(ks[4], (E, 4 * E), jnp.float32) * s     # Linear(4E, E).weight
    fb2 = jax.random.normal(ks[5], (1, E), jnp.float32) * s
    ln2g = jnp.ones((1, E), jnp.float32)
    ln2b = jnp.zeros((1, E), jnp.float32)

    wqkv_t = wqkv.T.astype(jnp.bfloat16)                              # (E, 3E)
    wo_heads = wo.T.reshape(num_heads, d, E).astype(jnp.bfloat16)     # (H, d, E)
    w1_t = w1.T.astype(jnp.bfloat16)                                  # (E, 4E)
    w2_t = w2.T.astype(jnp.bfloat16)                                  # (4E, E)
    return (wqkv_t, bqkv, wo_heads, bo, ln1g, ln1b,
            w1_t, fb1, w2_t, fb2, ln2g, ln2b)


if __name__ == "__main__":
    # hidden_size=256 / num_heads=8 match the module defaults (lane-dense E),
    # with small seq=8 and batch=2.
    L, N, E, H = 8, 2, 256, 8
    key = jax.random.PRNGKey(0)
    kx, kp = jax.random.split(key)
    x = jax.random.normal(kx, (L, N, E), jnp.float32)
    params = init_params(kp, E, H)

    fn = jax.jit(functools.partial(transformer_block, num_heads=H))
    out = fn(x, params)
    jax.block_until_ready(out)
    assert out.shape == (L, N, E) and out.dtype == jnp.float32
    print("KERNEL_OK")
</pallas_src>

<mosaic_0001>
module attributes {stable_mosaic.version = 11 : i64} {
  func.func @kernel(%arg0: i32, %arg1: memref<1x8x256xf32, #tpu.memory_space<vmem>>, %arg2: memref<256x768xbf16, #tpu.memory_space<vmem>>, %arg3: memref<1x768xf32, #tpu.memory_space<vmem>>, %arg4: memref<8x32x256xbf16, #tpu.memory_space<vmem>>, %arg5: memref<1x256xf32, #tpu.memory_space<vmem>>, %arg6: memref<1x256xf32, #tpu.memory_space<vmem>>, %arg7: memref<1x256xf32, #tpu.memory_space<vmem>>, %arg8: memref<256x1024xbf16, #tpu.memory_space<vmem>>, %arg9: memref<1x1024xf32, #tpu.memory_space<vmem>>, %arg10: memref<1024x256xbf16, #tpu.memory_space<vmem>>, %arg11: memref<1x256xf32, #tpu.memory_space<vmem>>, %arg12: memref<1x256xf32, #tpu.memory_space<vmem>>, %arg13: memref<1x256xf32, #tpu.memory_space<vmem>>, %arg14: memref<1x8x256xf32, #tpu.memory_space<vmem>>) attributes {dimension_semantics = [#tpu.dimension_semantics<parallel>], iteration_bounds = array<i64: 2>, scalar_prefetch = 0 : i64, scratch_operands = 0 : i64, tpu.core_type = #tpu.core_type<tc>, window_params = [{transform_indices = @transform_0, window_bounds = array<i64: 1, 8, 256>}, {pipeline_mode = #tpu.pipeline_mode<synchronous>, transform_indices = @transform_1, window_bounds = array<i64: 256, 768>}, {pipeline_mode = #tpu.pipeline_mode<synchronous>, transform_indices = @transform_2, window_bounds = array<i64: 1, 768>}, {pipeline_mode = #tpu.pipeline_mode<synchronous>, transform_indices = @transform_3, window_bounds = array<i64: 8, 32, 256>}, {pipeline_mode = #tpu.pipeline_mode<synchronous>, transform_indices = @transform_4, window_bounds = array<i64: 1, 256>}, {pipeline_mode = #tpu.pipeline_mode<synchronous>, transform_indices = @transform_5, window_bounds = array<i64: 1, 256>}, {pipeline_mode = #tpu.pipeline_mode<synchronous>, transform_indices = @transform_6, window_bounds = array<i64: 1, 256>}, {pipeline_mode = #tpu.pipeline_mode<synchronous>, transform_indices = @transform_7, window_bounds = array<i64: 256, 1024>}, {pipeline_mode = #tpu.pipeline_mode<synchronous>, transform_indices = @transform_8, window_bounds = array<i64: 1, 1024>}, {pipeline_mode = #tpu.pipeline_mode<synchronous>, transform_indices = @transform_9, window_bounds = array<i64: 1024, 256>}, {pipeline_mode = #tpu.pipeline_mode<synchronous>, transform_indices = @transform_10, window_bounds = array<i64: 1, 256>}, {pipeline_mode = #tpu.pipeline_mode<synchronous>, transform_indices = @transform_11, window_bounds = array<i64: 1, 256>}, {pipeline_mode = #tpu.pipeline_mode<synchronous>, transform_indices = @transform_12, window_bounds = array<i64: 1, 256>}, {transform_indices = @transform_13, window_bounds = array<i64: 1, 8, 256>}]} {
    %c0 = arith.constant 0 : index
    %c0_0 = arith.constant 0 : index
    %c0_1 = arith.constant 0 : index
    %0 = vector.load %arg1[%c0, %c0_0, %c0_1] : memref<1x8x256xf32, #tpu.memory_space<vmem>>, vector<1x8x256xf32>
    %1 = vector.shape_cast %0 : vector<1x8x256xf32> to vector<8x256xf32>
    %2 = arith.truncf %1 : vector<8x256xf32> to vector<8x256xbf16>
    %c0_2 = arith.constant 0 : index
    %c0_3 = arith.constant 0 : index
    %3 = vector.load %arg2[%c0_2, %c0_3] : memref<256x768xbf16, #tpu.memory_space<vmem>>, vector<256x768xbf16>
    %cst = arith.constant dense<0.000000e+00> : vector<8x768xf32>
    %4 = tpu.matmul %2, %3, %cst {dimension_numbers = #tpu.dot_dimension_numbers<[1], [0], [0], [1], [0, 0, 1, 1], [], []>} : vector<8x256xbf16>, vector<256x768xbf16>, vector<8x768xf32> -> vector<8x768xf32>
    %c0_4 = arith.constant 0 : index
    %c0_5 = arith.constant 0 : index
    %5 = vector.load %arg3[%c0_4, %c0_5] : memref<1x768xf32, #tpu.memory_space<vmem>>, vector<1x768xf32>
    %6 = vector.broadcast %5 : vector<1x768xf32> to vector<8x768xf32>
    %7 = arith.addf %4, %6 : vector<8x768xf32>
    %8 = vector.extract_strided_slice %7 {offsets = [0, 0], sizes = [8, 32], strides = [1, 1]} : vector<8x768xf32> to vector<8x32xf32>
    %9 = vector.extract_strided_slice %7 {offsets = [0, 256], sizes = [8, 32], strides = [1, 1]} : vector<8x768xf32> to vector<8x32xf32>
    %10 = vector.extract_strided_slice %7 {offsets = [0, 512], sizes = [8, 32], strides = [1, 1]} : vector<8x768xf32> to vector<8x32xf32>
    %11 = vector.extract_strided_slice %7 {offsets = [0, 32], sizes = [8, 32], strides = [1, 1]} : vector<8x768xf32> to vector<8x32xf32>
    %12 = vector.extract_strided_slice %7 {offsets = [0, 288], sizes = [8, 32], strides = [1, 1]} : vector<8x768xf32> to vector<8x32xf32>
    %13 = vector.extract_strided_slice %7 {offsets = [0, 544], sizes = [8, 32], strides = [1, 1]} : vector<8x768xf32> to vector<8x32xf32>
    %14 = vector.extract_strided_slice %7 {offsets = [0, 64], sizes = [8, 32], strides = [1, 1]} : vector<8x768xf32> to vector<8x32xf32>
    %15 = vector.extract_strided_slice %7 {offsets = [0, 320], sizes = [8, 32], strides = [1, 1]} : vector<8x768xf32> to vector<8x32xf32>
    %16 = vector.extract_strided_slice %7 {offsets = [0, 576], sizes = [8, 32], strides = [1, 1]} : vector<8x768xf32> to vector<8x32xf32>
    %17 = vector.extract_strided_slice %7 {offsets = [0, 96], sizes = [8, 32], strides = [1, 1]} : vector<8x768xf32> to vector<8x32xf32>
    %18 = vector.extract_strided_slice %7 {offsets = [0, 352], sizes = [8, 32], strides = [1, 1]} : vector<8x768xf32> to vector<8x32xf32>
    %19 = vector.extract_strided_slice %7 {offsets = [0, 608], sizes = [8, 32], strides = [1, 1]} : vector<8x768xf32> to vector<8x32xf32>
    %20 = vector.extract_strided_slice %7 {offsets = [0, 128], sizes = [8, 32], strides = [1, 1]} : vector<8x768xf32> to vector<8x32xf32>
    %21 = vector.extract_strided_slice %7 {offsets = [0, 384], sizes = [8, 32], strides = [1, 1]} : vector<8x768xf32> to vector<8x32xf32>
    %22 = vector.extract_strided_slice %7 {offsets = [0, 640], sizes = [8, 32], strides = [1, 1]} : vector<8x768xf32> to vector<8x32xf32>
    %23 = vector.extract_strided_slice %7 {offsets = [0, 160], sizes = [8, 32], strides = [1, 1]} : vector<8x768xf32> to vector<8x32xf32>
    %24 = vector.extract_strided_slice %7 {offsets = [0, 416], sizes = [8, 32], strides = [1, 1]} : vector<8x768xf32> to vector<8x32xf32>
    %25 = vector.extract_strided_slice %7 {offsets = [0, 672], sizes = [8, 32], strides = [1, 1]} : vector<8x768xf32> to vector<8x32xf32>
    %26 = vector.extract_strided_slice %7 {offsets = [0, 192], sizes = [8, 32], strides = [1, 1]} : vector<8x768xf32> to vector<8x32xf32>
    %27 = vector.extract_strided_slice %7 {offsets = [0, 448], sizes = [8, 32], strides = [1, 1]} : vector<8x768xf32> to vector<8x32xf32>
    %28 = vector.extract_strided_slice %7 {offsets = [0, 704], sizes = [8, 32], strides = [1, 1]} : vector<8x768xf32> to vector<8x32xf32>
    %29 = vector.extract_strided_slice %7 {offsets = [0, 224], sizes = [8, 32], strides = [1, 1]} : vector<8x768xf32> to vector<8x32xf32>
    %30 = vector.extract_strided_slice %7 {offsets = [0, 480], sizes = [8, 32], strides = [1, 1]} : vector<8x768xf32> to vector<8x32xf32>
    %31 = vector.extract_strided_slice %7 {offsets = [0, 736], sizes = [8, 32], strides = [1, 1]} : vector<8x768xf32> to vector<8x32xf32>
    %32 = vector.shape_cast %8 : vector<8x32xf32> to vector<1x8x32xf32>
    %33 = vector.shape_cast %11 : vector<8x32xf32> to vector<1x8x32xf32>
    %34 = vector.shape_cast %14 : vector<8x32xf32> to vector<1x8x32xf32>
    %35 = vector.shape_cast %17 : vector<8x32xf32> to vector<1x8x32xf32>
    %36 = vector.shape_cast %20 : vector<8x32xf32> to vector<1x8x32xf32>
    %37 = vector.shape_cast %23 : vector<8x32xf32> to vector<1x8x32xf32>
    %38 = vector.shape_cast %26 : vector<8x32xf32> to vector<1x8x32xf32>
    %39 = vector.shape_cast %29 : vector<8x32xf32> to vector<1x8x32xf32>
    %40 = tpu.concatenate %32, %33, %34, %35, %36, %37, %38, %39 in 0 : vector<1x8x32xf32>, vector<1x8x32xf32>, vector<1x8x32xf32>, vector<1x8x32xf32>, vector<1x8x32xf32>, vector<1x8x32xf32>, vector<1x8x32xf32>, vector<1x8x32xf32> -> vector<8x8x32xf32>
    %cst_6 = arith.constant 0.176776692 : f32
    %41 = vector.broadcast %cst_6 : f32 to vector<8x8x32xf32>
    %42 = arith.mulf %40, %41 : vector<8x8x32xf32>
    %43 = vector.shape_cast %9 : vector<8x32xf32> to vector<1x8x32xf32>
    %44 = vector.shape_cast %12 : vector<8x32xf32> to vector<1x8x32xf32>
    %45 = vector.shape_cast %15 : vector<8x32xf32> to vector<1x8x32xf32>
    %46 = vector.shape_cast %18 : vector<8x32xf32> to vector<1x8x32xf32>
    %47 = vector.shape_cast %21 : vector<8x32xf32> to vector<1x8x32xf32>
    %48 = vector.shape_cast %24 : vector<8x32xf32> to vector<1x8x32xf32>
    %49 = vector.shape_cast %27 : vector<8x32xf32> to vector<1x8x32xf32>
    %50 = vector.shape_cast %30 : vector<8x32xf32> to vector<1x8x32xf32>
    %51 = tpu.concatenate %43, %44, %45, %46, %47, %48, %49, %50 in 0 : vector<1x8x32xf32>, vector<1x8x32xf32>, vector<1x8x32xf32>, vector<1x8x32xf32>, vector<1x8x32xf32>, vector<1x8x32xf32>, vector<1x8x32xf32>, vector<1x8x32xf32> -> vector<8x8x32xf32>
    %52 = vector.shape_cast %10 : vector<8x32xf32> to vector<1x8x32xf32>
    %53 = vector.shape_cast %13 : vector<8x32xf32> to vector<1x8x32xf32>
    %54 = vector.shape_cast %16 : vector<8x32xf32> to vector<1x8x32xf32>
    %55 = vector.shape_cast %19 : vector<8x32xf32> to vector<1x8x32xf32>
    %56 = vector.shape_cast %22 : vector<8x32xf32> to vector<1x8x32xf32>
    %57 = vector.shape_cast %25 : vector<8x32xf32> to vector<1x8x32xf32>
    %58 = vector.shape_cast %28 : vector<8x32xf32> to vector<1x8x32xf32>
    %59 = vector.shape_cast %31 : vector<8x32xf32> to vector<1x8x32xf32>
    %60 = tpu.concatenate %52, %53, %54, %55, %56, %57, %58, %59 in 0 : vector<1x8x32xf32>, vector<1x8x32xf32>, vector<1x8x32xf32>, vector<1x8x32xf32>, vector<1x8x32xf32>, vector<1x8x32xf32>, vector<1x8x32xf32>, vector<1x8x32xf32> -> vector<8x8x32xf32>
    %61 = arith.truncf %42 : vector<8x8x32xf32> to vector<8x8x32xbf16>
    %62 = arith.truncf %51 : vector<8x8x32xf32> to vector<8x8x32xbf16>
    "tpu.trace_start"() <{level = 10 : i32, message = "hqd,hkd->hqk"}> : () -> ()
    %cst_7 = arith.constant dense<0.000000e+00> : vector<8x8x8xf32>
    %63 = tpu.matmul %61, %62, %cst_7 {dimension_numbers = #tpu.dot_dimension_numbers<[2], [2], [1], [1], [0, 0, 0, 1, 1, 1], [0], [0]>} : vector<8x8x32xbf16>, vector<8x8x32xbf16>, vector<8x8x8xf32> -> vector<8x8x8xf32>
    "tpu.trace_stop"() : () -> ()
    %cst_8 = arith.constant dense<0xFF800000> : vector<8x8xf32>
    %64 = vector.multi_reduction <maximumf>, %63, %cst_8 [2] : vector<8x8x8xf32> to vector<8x8xf32>
    %65 = vector.shape_cast %64 : vector<8x8xf32> to vector<8x8x1xf32>
    %66 = vector.broadcast %65 : vector<8x8x1xf32> to vector<8x8x8xf32>
    %67 = arith.subf %63, %66 : vector<8x8x8xf32>
    %68 = math.exp %67 : vector<8x8x8xf32>
    %cst_9 = arith.constant dense<0.000000e+00> : vector<8x8xf32>
    %69 = vector.multi_reduction <add>, %68, %cst_9 [2] : vector<8x8x8xf32> to vector<8x8xf32>
    %70 = vector.shape_cast %69 : vector<8x8xf32> to vector<8x8x1xf32>
    %71 = tpu.reciprocal %70 {approx = true} : vector<8x8x1xf32> -> vector<8x8x1xf32>
    %72 = vector.broadcast %71 : vector<8x8x1xf32> to vector<8x8x8xf32>
    %73 = arith.mulf %68, %72 : vector<8x8x8xf32>
    %74 = arith.truncf %73 : vector<8x8x8xf32> to vector<8x8x8xbf16>
    %75 = arith.truncf %60 : vector<8x8x32xf32> to vector<8x8x32xbf16>
    "tpu.trace_start"() <{level = 10 : i32, message = "hqk,hkd->hqd"}> : () -> ()
    %cst_10 = arith.constant dense<0.000000e+00> : vector<8x8x32xf32>
    %76 = tpu.matmul %74, %75, %cst_10 {dimension_numbers = #tpu.dot_dimension_numbers<[2], [1], [1], [2], [0, 0, 0, 1, 1, 2], [0], [0]>} : vector<8x8x8xbf16>, vector<8x8x32xbf16>, vector<8x8x32xf32> -> vector<8x8x32xf32>
    "tpu.trace_stop"() : () -> ()
    %77 = arith.truncf %76 : vector<8x8x32xf32> to vector<8x8x32xbf16>
    %c0_11 = arith.constant 0 : index
    %c0_12 = arith.constant 0 : index
    %c0_13 = arith.constant 0 : index
    %78 = vector.load %arg4[%c0_11, %c0_12, %c0_13] : memref<8x32x256xbf16, #tpu.memory_space<vmem>>, vector<8x32x256xbf16>
    "tpu.trace_start"() <{level = 10 : i32, message = "hqd,hde->hqe"}> : () -> ()
    %cst_14 = arith.constant dense<0.000000e+00> : vector<8x8x256xf32>
    %79 = tpu.matmul %77, %78, %cst_14 {dimension_numbers = #tpu.dot_dimension_numbers<[2], [1], [1], [2], [0, 0, 0, 1, 1, 2], [0], [0]>} : vector<8x8x32xbf16>, vector<8x32x256xbf16>, vector<8x8x256xf32> -> vector<8x8x256xf32>
    "tpu.trace_stop"() : () -> ()
    %cst_15 = arith.constant dense<0.000000e+00> : vector<8x256xf32>
    %80 = vector.multi_reduction <add>, %79, %cst_15 [0] : vector<8x8x256xf32> to vector<8x256xf32>
    %c0_16 = arith.constant 0 : index
    %c0_17 = arith.constant 0 : index
    %81 = vector.load %arg5[%c0_16, %c0_17] : memref<1x256xf32, #tpu.memory_space<vmem>>, vector<1x256xf32>
    %82 = vector.broadcast %81 : vector<1x256xf32> to vector<8x256xf32>
    %83 = arith.addf %80, %82 : vector<8x256xf32>
    %84 = arith.addf %1, %83 : vector<8x256xf32>
    %cst_18 = arith.constant dense<0.000000e+00> : vector<8xf32>
    %85 = vector.multi_reduction <add>, %84, %cst_18 [1] : vector<8x256xf32> to vector<8xf32>
    %86 = vector.shape_cast %85 : vector<8xf32> to vector<8x1xf32>
    %cst_19 = arith.constant 2.560000e+02 : f32
    %87 = vector.broadcast %cst_19 : f32 to vector<8x1xf32>
    %88 = arith.divf %86, %87 : vector<8x1xf32>
    %89 = vector.broadcast %88 : vector<8x1xf32> to vector<8x256xf32>
    %90 = arith.subf %84, %89 : vector<8x256xf32>
    %91 = arith.mulf %90, %90 : vector<8x256xf32>
    %cst_20 = arith.constant dense<0.000000e+00> : vector<8xf32>
    %92 = vector.multi_reduction <add>, %91, %cst_20 [1] : vector<8x256xf32> to vector<8xf32>
    %93 = vector.shape_cast %92 : vector<8xf32> to vector<8x1xf32>
    %cst_21 = arith.constant 2.560000e+02 : f32
    %94 = vector.broadcast %cst_21 : f32 to vector<8x1xf32>
    %95 = arith.divf %93, %94 : vector<8x1xf32>
    %cst_22 = arith.constant 9.99999974E-6 : f32
    %96 = vector.broadcast %cst_22 : f32 to vector<8x1xf32>
    %97 = arith.addf %95, %96 : vector<8x1xf32>
    %98 = math.rsqrt %97 : vector<8x1xf32>
    %99 = vector.broadcast %98 : vector<8x1xf32> to vector<8x256xf32>
    %100 = arith.mulf %90, %99 : vector<8x256xf32>
    %c0_23 = arith.constant 0 : index
    %c0_24 = arith.constant 0 : index
    %101 = vector.load %arg6[%c0_23, %c0_24] : memref<1x256xf32, #tpu.memory_space<vmem>>, vector<1x256xf32>
    %102 = vector.broadcast %101 : vector<1x256xf32> to vector<8x256xf32>
    %103 = arith.mulf %100, %102 : vector<8x256xf32>
    %c0_25 = arith.constant 0 : index
    %c0_26 = arith.constant 0 : index
    %104 = vector.load %arg7[%c0_25, %c0_26] : memref<1x256xf32, #tpu.memory_space<vmem>>, vector<1x256xf32>
    %105 = vector.broadcast %104 : vector<1x256xf32> to vector<8x256xf32>
    %106 = arith.addf %103, %105 : vector<8x256xf32>
    %107 = arith.truncf %106 : vector<8x256xf32> to vector<8x256xbf16>
    %c0_27 = arith.constant 0 : index
    %c0_28 = arith.constant 0 : index
    %108 = vector.load %arg8[%c0_27, %c0_28] : memref<256x1024xbf16, #tpu.memory_space<vmem>>, vector<256x1024xbf16>
    %cst_29 = arith.constant dense<0.000000e+00> : vector<8x1024xf32>
    %109 = tpu.matmul %107, %108, %cst_29 {dimension_numbers = #tpu.dot_dimension_numbers<[1], [0], [0], [1], [0, 0, 1, 1], [], []>} : vector<8x256xbf16>, vector<256x1024xbf16>, vector<8x1024xf32> -> vector<8x1024xf32>
    %c0_30 = arith.constant 0 : index
    %c0_31 = arith.constant 0 : index
    %110 = vector.load %arg9[%c0_30, %c0_31] : memref<1x1024xf32, #tpu.memory_space<vmem>>, vector<1x1024xf32>
    %111 = vector.broadcast %110 : vector<1x1024xf32> to vector<8x1024xf32>
    %112 = arith.addf %109, %111 : vector<8x1024xf32>
    %cst_32 = arith.constant 0.000000e+00 : f32
    %113 = vector.broadcast %cst_32 : f32 to vector<8x1024xf32>
    %114 = arith.maximumf %112, %113 : vector<8x1024xf32>
    %115 = arith.truncf %114 : vector<8x1024xf32> to vector<8x1024xbf16>
    %c0_33 = arith.constant 0 : index
    %c0_34 = arith.constant 0 : index
    %116 = vector.load %arg10[%c0_33, %c0_34] : memref<1024x256xbf16, #tpu.memory_space<vmem>>, vector<1024x256xbf16>
    %cst_35 = arith.constant dense<0.000000e+00> : vector<8x256xf32>
    %117 = tpu.matmul %115, %116, %cst_35 {dimension_numbers = #tpu.dot_dimension_numbers<[1], [0], [0], [1], [0, 0, 1, 1], [], []>} : vector<8x1024xbf16>, vector<1024x256xbf16>, vector<8x256xf32> -> vector<8x256xf32>
    %c0_36 = arith.constant 0 : index
    %c0_37 = arith.constant 0 : index
    %118 = vector.load %arg11[%c0_36, %c0_37] : memref<1x256xf32, #tpu.memory_space<vmem>>, vector<1x256xf32>
    %119 = vector.broadcast %118 : vector<1x256xf32> to vector<8x256xf32>
    %120 = arith.addf %117, %119 : vector<8x256xf32>
    %121 = arith.addf %106, %120 : vector<8x256xf32>
    %cst_38 = arith.constant dense<0.000000e+00> : vector<8xf32>
    %122 = vector.multi_reduction <add>, %121, %cst_38 [1] : vector<8x256xf32> to vector<8xf32>
    %123 = vector.shape_cast %122 : vector<8xf32> to vector<8x1xf32>
    %cst_39 = arith.constant 2.560000e+02 : f32
    %124 = vector.broadcast %cst_39 : f32 to vector<8x1xf32>
    %125 = arith.divf %123, %124 : vector<8x1xf32>
    %126 = vector.broadcast %125 : vector<8x1xf32> to vector<8x256xf32>
    %127 = arith.subf %121, %126 : vector<8x256xf32>
    %128 = arith.mulf %127, %127 : vector<8x256xf32>
    %cst_40 = arith.constant dense<0.000000e+00> : vector<8xf32>
    %129 = vector.multi_reduction <add>, %128, %cst_40 [1] : vector<8x256xf32> to vector<8xf32>
    %130 = vector.shape_cast %129 : vector<8xf32> to vector<8x1xf32>
    %cst_41 = arith.constant 2.560000e+02 : f32
    %131 = vector.broadcast %cst_41 : f32 to vector<8x1xf32>
    %132 = arith.divf %130, %131 : vector<8x1xf32>
    %cst_42 = arith.constant 9.99999974E-6 : f32
    %133 = vector.broadcast %cst_42 : f32 to vector<8x1xf32>
    %134 = arith.addf %132, %133 : vector<8x1xf32>
    %135 = math.rsqrt %134 : vector<8x1xf32>
    %136 = vector.broadcast %135 : vector<8x1xf32> to vector<8x256xf32>
    %137 = arith.mulf %127, %136 : vector<8x256xf32>
    %c0_43 = arith.constant 0 : index
    %c0_44 = arith.constant 0 : index
    %138 = vector.load %arg12[%c0_43, %c0_44] : memref<1x256xf32, #tpu.memory_space<vmem>>, vector<1x256xf32>
    %139 = vector.broadcast %138 : vector<1x256xf32> to vector<8x256xf32>
    %140 = arith.mulf %137, %139 : vector<8x256xf32>
    %c0_45 = arith.constant 0 : index
    %c0_46 = arith.constant 0 : index
    %141 = vector.load %arg13[%c0_45, %c0_46] : memref<1x256xf32, #tpu.memory_space<vmem>>, vector<1x256xf32>
    %142 = vector.broadcast %141 : vector<1x256xf32> to vector<8x256xf32>
    %143 = arith.addf %140, %142 : vector<8x256xf32>
    %c0_47 = arith.constant 0 : index
    %c0_48 = arith.constant 0 : index
    %c0_49 = arith.constant 0 : index
    %144 = vector.load %arg14[%c0_47, %c0_48, %c0_49] : memref<1x8x256xf32, #tpu.memory_space<vmem>>, vector<1x8x256xf32>
    %145 = vector.shape_cast %144 : vector<1x8x256xf32> to vector<8x256xf32>
    %146 = vector.shape_cast %143 : vector<8x256xf32> to vector<1x8x256xf32>
    tpu.vector_store %arg14[%c0_47, %c0_48, %c0_49], %146 {strides = array<i32>} : memref<1x8x256xf32, #tpu.memory_space<vmem>>, vector<1x8x256xf32>,
    return
  }
  func.func @transform_0(%arg0: i32) -> (i32, i32, i32) {
    %c0_i32 = arith.constant 0 : i32
    %c0_i32_0 = arith.constant 0 : i32
    %c0_i32_1 = arith.constant 0 : i32
    return %arg0, %c0_i32, %c0_i32_0 : i32, i32, i32
  }
  func.func @transform_1(%arg0: i32) -> (i32, i32) {
    %c0_i32 = arith.constant 0 : i32
    %c0_i32_0 = arith.constant 0 : i32
    %c0_i32_1 = arith.constant 0 : i32
    return %c0_i32, %c0_i32_0 : i32, i32
  }
  func.func @transform_2(%arg0: i32) -> (i32, i32) {
    %c0_i32 = arith.constant 0 : i32
    %c0_i32_0 = arith.constant 0 : i32
    %c0_i32_1 = arith.constant 0 : i32
    return %c0_i32, %c0_i32_0 : i32, i32
  }
  func.func @transform_3(%arg0: i32) -> (i32, i32, i32) {
    %c0_i32 = arith.constant 0 : i32
    %c0_i32_0 = arith.constant 0 : i32
    %c0_i32_1 = arith.constant 0 : i32
    %c0_i32_2 = arith.constant 0 : i32
    return %c0_i32, %c0_i32_0, %c0_i32_1 : i32, i32, i32
  }
  func.func @transform_4(%arg0: i32) -> (i32, i32) {
    %c0_i32 = arith.constant 0 : i32
    %c0_i32_0 = arith.constant 0 : i32
    %c0_i32_1 = arith.constant 0 : i32
    return %c0_i32, %c0_i32_0 : i32, i32
  }
  func.func @transform_5(%arg0: i32) -> (i32, i32) {
    %c0_i32 = arith.constant 0 : i32
    %c0_i32_0 = arith.constant 0 : i32
    %c0_i32_1 = arith.constant 0 : i32
    return %c0_i32, %c0_i32_0 : i32, i32
  }
  func.func @transform_6(%arg0: i32) -> (i32, i32) {
    %c0_i32 = arith.constant 0 : i32
    %c0_i32_0 = arith.constant 0 : i32
    %c0_i32_1 = arith.constant 0 : i32
    return %c0_i32, %c0_i32_0 : i32, i32
  }
  func.func @transform_7(%arg0: i32) -> (i32, i32) {
    %c0_i32 = arith.constant 0 : i32
    %c0_i32_0 = arith.constant 0 : i32
    %c0_i32_1 = arith.constant 0 : i32
    return %c0_i32, %c0_i32_0 : i32, i32
  }
  func.func @transform_8(%arg0: i32) -> (i32, i32) {
    %c0_i32 = arith.constant 0 : i32
    %c0_i32_0 = arith.constant 0 : i32
    %c0_i32_1 = arith.constant 0 : i32
    return %c0_i32, %c0_i32_0 : i32, i32
  }
  func.func @transform_9(%arg0: i32) -> (i32, i32) {
    %c0_i32 = arith.constant 0 : i32
    %c0_i32_0 = arith.constant 0 : i32
    %c0_i32_1 = arith.constant 0 : i32
    return %c0_i32, %c0_i32_0 : i32, i32
  }
  func.func @transform_10(%arg0: i32) -> (i32, i32) {
    %c0_i32 = arith.constant 0 : i32
    %c0_i32_0 = arith.constant 0 : i32
    %c0_i32_1 = arith.constant 0 : i32
    return %c0_i32, %c0_i32_0 : i32, i32
  }
  func.func @transform_11(%arg0: i32) -> (i32, i32) {
    %c0_i32 = arith.constant 0 : i32
    %c0_i32_0 = arith.constant 0 : i32
    %c0_i32_1 = arith.constant 0 : i32
    return %c0_i32, %c0_i32_0 : i32, i32
  }
  func.func @transform_12(%arg0: i32) -> (i32, i32) {
    %c0_i32 = arith.constant 0 : i32
    %c0_i32_0 = arith.constant 0 : i32
    %c0_i32_1 = arith.constant 0 : i32
    return %c0_i32, %c0_i32_0 : i32, i32
  }
  func.func @transform_13(%arg0: i32) -> (i32, i32, i32) {
    %c0_i32 = arith.constant 0 : i32
    %c0_i32_0 = arith.constant 0 : i32
    %c0_i32_1 = arith.constant 0 : i32
    return %arg0, %c0_i32, %c0_i32_0 : i32, i32, i32
  }
}

</mosaic_0001>

<bundles_post_ra>
// kernel: transformer_block.1
= control target key start
LH: loop header
LB: loop body
LE: loop exit
PB: predicated region body
PF: predicated region fallthrough
CT: control target
= control target key end

     0   :  { %18 = vsyncpa [#allocation3], 0  ;;  %s6558_s0 = inlined_call_operand.vmem [shape: f32[2,8,256], index: 0, kind: input, shape index: {}]   ;;  %s6559_s1 = inlined_call_operand.hbm [shape: bf16[256,768], index: 1, kind: input, shape index: {}]   ;;  %s6560_s2 = inlined_call_operand.vmem [shape: f32[1,768], index: 2, kind: input, shape index: {}]   ;;  %s6561_s3 = inlined_call_operand.hbm [shape: bf16[8,32,256], index: 3, kind: input, shape index: {}]   ;;  %s6562_s4 = inlined_call_operand.vmem [shape: f32[1,256], index: 4, kind: input, shape index: {}]   ;;  %s6563_s5 = inlined_call_operand.vmem [shape: f32[1,256], index: 5, kind: input, shape index: {}]   ;;  %s6564_s6 = inlined_call_operand.vmem [shape: f32[1,256], index: 6, kind: input, shape index: {}]   ;;  %s6565_s7 = inlined_call_operand.hbm [shape: bf16[256,1024], index: 7, kind: input, shape index: {}]   ;;  %s6566_s8 = inlined_call_operand.vmem [shape: f32[1,1024], index: 8, kind: input, shape index: {}]   ;;  %s6567_s9 = inlined_call_operand.hbm [shape: bf16[1024,256], index: 9, kind: input, shape index: {}]   ;;  %s6568_s10 = inlined_call_operand.vmem [shape: f32[1,256], index: 10, kind: input, shape index: {}]   ;;  %s6569_s11 = inlined_call_operand.vmem [shape: f32[1,256], index: 11, kind: input, shape index: {}]   ;;  %s6570_s12 = inlined_call_operand.vmem [shape: f32[1,256], index: 12, kind: input, shape index: {}]   ;;  %s6571_s13 = inlined_call_operand.vmem [shape: f32[2,8,256], index: 13, kind: output, shape index: {}]  }
   0x1   :  { %19 = vsyncpa [#allocation5], 0 }
   0x2   :  { %20 = vsyncpa [#allocation8], 0  ;;  %s6120_s25 = smov 0  }
   0x3 LB: > { %s6034_s26 = smov [#allocation4]   ;;  %s6126_s28 = sadd.s32 4294967295, %s6032_s25   ;;  %s6032_s25 = sphi %s6120_s25, %s26_s25  }
   0x4   : > { %s363_s27 = sshll.u32 %s6034_s26, 4  ;;  %p4872_p0 = scmp.ge.s32.totalorder %s6032_s25, 1  ;;  %s364_s27 = int_to_ptr.vmem [resolvable:$true] %s363_s27 }
   0x5   : > { %p335_p1 = scmp.lt.s32.totalorder %s6032_s25, 3  ;;  %p5456_p2 = scmp.eq.s32.totalorder %s6126_s28, 0 }
   0x6   : > { %s6035_s30 = smov [#allocation2]   ;;  %s6036_s16 = smov [#allocation6]  }
   0x7   : > { %p6131_p3 = pnand %p4872_p0, %p335_p1  ;;  %s347_s14 = sshll.u32 %s6035_s30, 4  ;;  %s6137_s14 = int_to_ptr.vmem [resolvable:$true] %s347_s14 }
   0x8   : > { %s6145_s17 = sshll.u32 %s6036_s16, 4  ;;  %s5921_s18 = scalar_lea.vmem %s364_s27, 4096  ;;  %s386_s17 = int_to_ptr.vmem [resolvable:$true] %s6145_s17 }
   0x9   : > { %p5443_p4 = pneg %p6131_p3  ;;  %p5922_p7 = scmp.ne.s32.totalorder %s364_s27, %s5921_s18 }
   0xa   : > { %p5929_p10 = scmp.lt.s32.totalorder %s364_s27, %s364_s27  ;;  %p5930_p11 = scmp.lt.s32.totalorder %s5921_s18, %s5921_s18 }
   0xb   : > { %p6141_p5 = pnand %p5456_p2, %p5443_p4 }
   0xc   : > { %p5931_p12 = por %p5930_p11, %p5929_p10 }
   0xd   : > { %p5912_p6 = pneg %p6141_p5 }
   0xf   : > { %p5924_p8 = pnand %p5922_p7, %p5912_p6 }
  0x11   : > { %p5925_p9 = pneg %p5924_p8 }
  0x13   : > { %p5932_p13 = pnand %p5931_p12, %p5925_p9 }
  0x15   : > { %5935 = shalt.err (!%p5932_p13)
}
  0x16   : > { %s6037_s19 = smov 128   ;;  %s6038_s20 = smov 8  }
  0x17   : > { %5449 = dma.hbm_to_vmem [thread:$0]  (!%p6141_p5), %s6561_s3, 4096, %s364_s27, [#allocation5], %s6037_s19, %s6037_s19, %s6038_s20  }
  0x18   : > { %s5947_s23 = scalar_lea.vmem %s6137_s14, 12288  ;;  %p5955_p7 = scmp.lt.s32.totalorder %s6137_s14, %s6137_s14 }
  0x19   : > { %p5948_p0 = scmp.ne.s32.totalorder %s6137_s14, %s5947_s23  ;;  %p5956_p8 = scmp.lt.s32.totalorder %s5947_s23, %s5947_s23 }
  0x1b   : > { %p5950_p1 = pnand %p5948_p0, %p5912_p6  ;;  %p5957_p9 = por %p5956_p8, %p5955_p7 }
  0x1d   : > { %p5951_p4 = pneg %p5950_p1 }
  0x1f   : > { %p5958_p10 = pnand %p5957_p9, %p5951_p4 }
  0x21   : > { %5961 = shalt.err (!%p5958_p10)
}
  0x22   : > { %s6039_s24 = smov 384   ;;  %s6040_s26 = smov 24  }
  0x23   : > { %5446 = dma.hbm_to_vmem [thread:$0]  (!%p6141_p5), %s6559_s1, 12288, %s6137_s14, [#allocation3], %s6039_s24, %s6039_s24, %s6040_s26  }
  0x24   : > { %s5973_s16 = scalar_lea.vmem %s386_s17, 16384  ;;  %p5981_p0 = scmp.lt.s32.totalorder %s386_s17, %s386_s17 }
  0x25   : > { %p5974_p11 = scmp.ne.s32.totalorder %s386_s17, %s5973_s16  ;;  %p5982_p1 = scmp.lt.s32.totalorder %s5973_s16, %s5973_s16 }
  0x27   : > { %p5976_p12 = pnand %p5974_p11, %p5912_p6  ;;  %p5983_p4 = por %p5982_p1, %p5981_p0 }
  0x29   : > { %p5977_p13 = pneg %p5976_p12 }
  0x2b   : > { %p5984_p7 = pnand %p5983_p4, %p5977_p13 }
  0x2d   : > { %5987 = shalt.err (!%p5984_p7)
}
  0x2e   : > { %s6041_s18 = smov 512   ;;  %s6042_s21 = smov 32  }
  0x2f   : > { %5452 = dma.hbm_to_vmem [thread:$0]  (!%p6141_p5), %s6565_s7, 16384, %s386_s17, [#allocation5], %s6041_s18, %s6041_s18, %s6042_s21  }
  0x30   : > { %s6043_s14 = smov [#allocation7]  }
  0x31   : > { %s401_s24 = sshll.u32 %s6043_s14, 4  ;;  %s402_s24 = int_to_ptr.vmem [resolvable:$true] %s401_s24 }
  0x32   : > { %s5999_s26 = scalar_lea.vmem %s402_s24, 16384  ;;  %p6007_p11 = scmp.lt.s32.totalorder %s402_s24, %s402_s24 }
  0x33   : > { %p6000_p8 = scmp.ne.s32.totalorder %s402_s24, %s5999_s26  ;;  %p6008_p12 = scmp.lt.s32.totalorder %s5999_s26, %s5999_s26 }
  0x35   : > { %p6002_p9 = pnand %p6000_p8, %p5912_p6  ;;  %p6009_p13 = por %p6008_p12, %p6007_p11 }
  0x37   : > { %p6003_p10 = pneg %p6002_p9 }
  0x39   : > { %p6010_p0 = pnand %p6009_p13, %p6003_p10 }
  0x3b   : > { %6013 = shalt.err (!%p6010_p0)
}
  0x3c   : > { %5455 = dma.hbm_to_vmem [thread:$0]  (!%p6141_p5), %s6567_s9, 16384, %s402_s24, [#allocation8], %s6037_s19, %s6037_s19, %s6038_s20  }
  0x3d   : > { %434 = sbr.rel (%p6131_p3) target bundleno = 2527 (0x9df), region = 72 }
  0x42   : > { %6019 = dma.done.wait (%p5456_p2), [#allocation3], 12288  }
  0x43   : > { %6021 = vsyncadd (%p5456_p2), [#allocation3], 4294955008 }
  0x44   : > { %6023 = dma.done.wait (%p5456_p2), [#allocation5], 20480  }
  0x45   : > { %6025 = vsyncadd (%p5456_p2), [#allocation5], 4294946816 }
  0x46   : > { %6027 = dma.done.wait (%p5456_p2), [#allocation8], 16384  }
  0x47   : > { %6029 = vsyncadd (%p5456_p2), [#allocation8], 4294950912  ;;  %v5488_v0 = vld [vmem:[#allocation2 + $0x15c] ss:$24 sps:$4 sm:$0xff]   ;;  %v5492_v2 = vld [vmem:[#allocation2 + $0x158] ss:$24 sps:$4 sm:$0xff]  }
  0x48   : > { %v5490_v1 = vld [vmem:[#allocation2 + $0x154] ss:$24 sps:$4 sm:$0xff]   ;;  %1154 = vmatprep.subr.bf16.mxu1 %v5488_v0  ;;  %v5493_v3 = vld [vmem:[#allocation2 + $0x150] ss:$24 sps:$4 sm:$0xff]   ;;  %v5496_v5 = vld [vmem:[#allocation2 + $0x124] ss:$24 sps:$4 sm:$0xff]  }
  0x49   : > { %1113 = vmatprep.subr.bf16.mxu0 %v5490_v1  ;;  %v5494_v4 = vld [vmem:[#allocation2 + $0x12c] ss:$24 sps:$4 sm:$0xff]   ;;  %1155 = vmatpush1.bf16.msra.mxu1 %v5492_v2  ;;  %v5498_v6 = vld [vmem:[#allocation2 + $0x128] ss:$24 sps:$4 sm:$0xff]   ;;  %v5500_v8 = vld [vmem:[#allocation2 + $0xfc] ss:$24 sps:$4 sm:$0xff]  }
  0x4a   : > { %1114 = vmatpush1.bf16.msra.mxu0 %v5493_v3  ;;  %1156 = vmatprep.subr.bf16.mxu1 %v5494_v4  ;;  %v5499_v7 = vld [vmem:[#allocation2 + $0x120] ss:$24 sps:$4 sm:$0xff]   ;;  %v5502_v9 = vld [vmem:[#allocation2 + $0xf4] ss:$24 sps:$4 sm:$0xff]   ;;  %v5505_v11 = vld [vmem:[#allocation2 + $0xf0] ss:$24 sps:$4 sm:$0xff]  }
  0x4b   : > { %1115 = vmatprep.subr.bf16.mxu0 %v5496_v5  ;;  %v5504_v10 = vld [vmem:[#allocation2 + $0xf8] ss:$24 sps:$4 sm:$0xff]   ;;  %v5506_v12 = vld [vmem:[#allocation2 + $0xcc] ss:$24 sps:$4 sm:$0xff]   ;;  %v5510_v14 = vld [vmem:[#allocation2 + $0xc8] ss:$24 sps:$4 sm:$0xff]   ;;  %v603_v5 = vlaneseq }
  0x4c   : > { %v5508_v13 = vld [vmem:[#allocation2 + $0xc4] ss:$24 sps:$4 sm:$0xff]   ;;  %v5511_v15 = vld [vmem:[#allocation2 + $0xc0] ss:$24 sps:$4 sm:$0xff]   ;;  %v5514_v17 = vld [vmem:[#allocation2 + $0x94] ss:$24 sps:$4 sm:$0xff]  }
  0x4d   : > { %1157 = vmatpush1.bf16.msra.mxu1 %v5498_v6  ;;  %v5512_v16 = vld [vmem:[#allocation2 + $0x9c] ss:$24 sps:$4 sm:$0xff]   ;;  %v5516_v18 = vld [vmem:[#allocation2 + $0x98] ss:$24 sps:$4 sm:$0xff]   ;;  %v5518_v20 = vld [vmem:[#allocation2 + $0x6c] ss:$24 sps:$4 sm:$0xff]  }
  0x4e   : > { %1116 = vmatpush1.bf16.msra.mxu0 %v5499_v7  ;;  %1158 = vmatprep.subr.bf16.mxu1 %v5500_v8  ;;  %v5517_v19 = vld [vmem:[#allocation2 + $0x90] ss:$24 sps:$4 sm:$0xff]   ;;  %v5520_v21 = vld [vmem:[#allocation2 + $0x64] ss:$24 sps:$4 sm:$0xff]   ;;  %v5523_v23 = vld [vmem:[#allocation2 + $0x60] ss:$24 sps:$4 sm:$0xff]  }
  0x4f   : > { %1117 = vmatprep.subr.bf16.mxu0 %v5502_v9  ;;  %v5522_v22 = vld [vmem:[#allocation2 + $0x68] ss:$24 sps:$4 sm:$0xff]   ;;  %v5524_v24 = vld [vmem:[#allocation2 + $0x3c] ss:$24 sps:$4 sm:$0xff]   ;;  %v5528_v26 = vld [vmem:[#allocation2 + $0x38] ss:$24 sps:$4 sm:$0xff]  }
  0x50   : > { %v5526_v25 = vld [vmem:[#allocation2 + $0x34] ss:$24 sps:$4 sm:$0xff]   ;;  %v5529_v27 = vld [vmem:[#allocation2 + $0x30] ss:$24 sps:$4 sm:$0xff]   ;;  %v5532_v29 = vld [vmem:[#allocation2 + $0x4] ss:$24 sps:$4 sm:$0xff]  }
  0x51   : > { %1159 = vmatpush1.bf16.msra.mxu1 %v5504_v10  ;;  %v5530_v28 = vld [vmem:[#allocation2 + $0xc] ss:$24 sps:$4 sm:$0xff]   ;;  %v5534_v30 = vld [vmem:[#allocation2 + $0x8] ss:$24 sps:$4 sm:$0xff]   ;;  %v5536_v32 = vld [vmem:[#allocation2 + $0x2dc] ss:$24 sps:$4 sm:$0xff]  }
  0x52   : > { %1118 = vmatpush1.bf16.msra.mxu0 %v5505_v11  ;;  %1160 = vmatprep.subr.bf16.mxu1 %v5506_v12  ;;  %v5535_v31 = vld [vmem:[#allocation2] ss:$24 sps:$4 sm:$0xff]   ;;  %p490_p2 = scmp.lt.s32.totalorder %s6126_s28, 1  ;;  %v5538_v33 = vld [vmem:[#allocation2 + $0x2d4] ss:$24 sps:$4 sm:$0xff]   ;;  %v6044_v4 = vmov 0.0  }
  0x53   : > { %1119 = vmatprep.subr.bf16.mxu0 %v5508_v13  ;;  %v5540_v34 = vld [vmem:[#allocation2 + $0x2d8] ss:$24 sps:$4 sm:$0xff]   ;;  %v5542_v36 = vld [vmem:[#allocation2 + $0x2ac] ss:$24 sps:$4 sm:$0xff]   ;;  %v5546_v38 = vld [vmem:[#allocation2 + $0x2a8] ss:$24 sps:$4 sm:$0xff]  }
  0x54   : > { %v5541_v35 = vld [vmem:[#allocation2 + $0x2d0] ss:$24 sps:$4 sm:$0xff]   ;;  %s6575_s28 = smov (!%p490_p2, %s6126_s28), 1  ;;  %v5544_v37 = vld [vmem:[#allocation2 + $0x2a4] ss:$24 sps:$4 sm:$0xff]   ;;  %vm6045_vm0 = vmmov 0  }
  0x55   : > { %1161 = vmatpush1.bf16.msra.mxu1 %v5510_v14  ;;  %v5547_v39 = vld [vmem:[#allocation2 + $0x2a0] ss:$24 sps:$4 sm:$0xff]   ;;  %v5548_v40 = vld [vmem:[#allocation2 + $0x27c] ss:$24 sps:$4 sm:$0xff]   ;;  %s5297_s29 = sshll.u32 %s6575_s28, 4  ;;  %v6228_v6 = vshrl.u32 %v603_v5, 7 }
  0x56   : > { %1120 = vmatpush1.bf16.msra.mxu0 %v5511_v15  ;;  %1162 = vmatprep.subr.bf16.mxu1 %v5512_v16  ;;  %v5550_v41 = vld [vmem:[#allocation2 + $0x274] ss:$24 sps:$4 sm:$0xff]   ;;  %v5552_v42 = vld [vmem:[#allocation2 + $0x278] ss:$24 sps:$4 sm:$0xff]   ;;  %s6217_s20 = scalar_lea.vmem %s6558_s0, %s5297_s29  ;;  %v5556_v45 = vld [vmem:[#allocation2 + $0x244] ss:$24 sps:$4 sm:$0xff]   ;;  %s499_s24 = scalar_lea.vmem %s6571_s13, %s5297_s29 }
  0x57   : > { %1121 = vmatprep.subr.bf16.mxu0 %v5514_v17  ;;  %v5553_v43 = vld [vmem:[#allocation2 + $0x270] ss:$24 sps:$4 sm:$0xff]   ;;  %v5554_v44 = vld [vmem:[#allocation2 + $0x24c] ss:$24 sps:$4 sm:$0xff]   ;;  %v5559_v47 = vld [vmem:[#allocation2 + $0x240] ss:$24 sps:$4 sm:$0xff]  }
  0x58   : > { %v5558_v46 = vld [vmem:[#allocation2 + $0x248] ss:$24 sps:$4 sm:$0xff]   ;;  %v5560_v49 = vld [vmem:[#allocation2 + $0x21c] ss:$24 sps:$4 sm:$0xff]   ;;  %v5564_v52 = vld [vmem:[#allocation2 + $0x218] ss:$24 sps:$4 sm:$0xff]  }
  0x59   : > { %1163 = vmatpush1.bf16.msra.mxu1 %v5516_v18  ;;  %v502_v48 = vld [vmem:[%s6217_s20 + $0x8] sm:$0xff]  ;;  %v5568_v55 = vld [vmem:[#allocation2 + $0x1e4] ss:$24 sps:$4 sm:$0xff]   ;;  %v5571_v57 = vld [vmem:[#allocation2 + $0x1e0] ss:$24 sps:$4 sm:$0xff]   ;;  %v613_v7 = vsub.s32 2, %v6228_v6 }
  0x5a   : > { %1122 = vmatpush1.bf16.msra.mxu0 %v5517_v19  ;;  %1164 = vmatprep.subr.bf16.mxu1 %v5518_v20  ;;  %v5562_v50 = vld [vmem:[#allocation2 + $0x214] ss:$24 sps:$4 sm:$0xff]   ;;  %v504_v51 = vpack.c.bf16 %v502_v48, %v502_v48  ;;  %v5565_v53 = vld [vmem:[#allocation2 + $0x210] ss:$24 sps:$4 sm:$0xff]   ;;  %v5580_v63 = vld [vmem:[#allocation2 + $0x184] ss:$24 sps:$4 sm:$0xff]  }
  0x5b   : > { %1123 = vmatprep.subr.bf16.mxu0 %v5520_v21  ;;  %v5566_v54 = vld [vmem:[#allocation2 + $0x1ec] ss:$24 sps:$4 sm:$0xff]   ;;  %v5570_v56 = vld [vmem:[#allocation2 + $0x1e8] ss:$24 sps:$4 sm:$0xff]   ;;  %v5572_v58 = vld [vmem:[#allocation2 + $0x1bc] ss:$24 sps:$4 sm:$0xff]  }
  0x5c   : > { %1186 = vmatprep.mubr.bf16.mxu1 %v504_v51  ;;  %1145 = vmatprep.mubr.bf16.mxu0 %v504_v51  ;;  %v5574_v59 = vld [vmem:[#allocation2 + $0x1b4] ss:$24 sps:$4 sm:$0xff]   ;;  %v5576_v60 = vld [vmem:[#allocation2 + $0x1b8] ss:$24 sps:$4 sm:$0xff]   ;;  %v5582_v0 = vld [vmem:[#allocation2 + $0x188] ss:$24 sps:$4 sm:$0xff]  }
  0x5d   : > { %1165 = vmatpush1.bf16.msra.mxu1 %v5522_v22  ;;  %v5577_v61 = vld [vmem:[#allocation2 + $0x1b0] ss:$24 sps:$4 sm:$0xff]   ;;  %v5578_v62 = vld [vmem:[#allocation2 + $0x18c] ss:$24 sps:$4 sm:$0xff]   ;;  %v5583_v1 = vld [vmem:[#allocation2 + $0x180] ss:$24 sps:$4 sm:$0xff]  }
  0x5e   : > { %1124 = vmatpush1.bf16.msra.mxu0 %v5523_v23  ;;  %1166 = vmatprep.subr.bf16.mxu1 %v5524_v24  ;;  %v501_v2 = vld [vmem:[%s6217_s20] sm:$0xff]  ;;  %v6237_v9 = vsub.s32 0, %v6228_v6  ;;  %vm1320_vm1 = vcmask 261120   ;;  %s6046_s18 = smov 64   ;;  %s6047_s21 = smov 96   ;;  %v617_v22 = vsub.s32 3, %v6228_v6 }
  0x5f   : > { %1125 = vmatprep.subr.bf16.mxu0 %v5526_v25  ;;  %v6221_v3 = vpack.c.bf16 %v501_v2, %v501_v2  ;;  %v6234_v8 = vld [vmem:[%s6560_s2] sm:$0x3f]  ;;  %v6248_v23 = vsub.s32 1, %v6228_v6  ;;  %s6048_s22 = smov 32   ;;  %vm1689_vm2 = vcmask 64512   ;;  %vm1797_vm3 = vcmask 1043456  }
  0x60   : > { %v614_v10 = vrot.slane %v6234_v8, %v613_v7  ;;  %v606_v11 = vrot.slane %v6234_v8, %v6237_v9  ;;  %v5610_v48 = vld [vmem:[#allocation2 + $0x2e4] ss:$24 sps:$4 sm:$0xff]  }
  0x61   : > { %1167 = vmatpush1.bf16.msra.mxu1 %v5528_v26 }
  0x62   : > { %1126 = vmatpush1.bf16.msra.mxu0 %v5529_v27  ;;  %1168 = vmatprep.subr.bf16.mxu1 %v5530_v28  ;;  %v618_v28 = vrot.slane %v6234_v8, %v617_v22 }
  0x63   : > { %1127 = vmatprep.subr.bf16.mxu0 %v5532_v29  ;;  %v610_v29 = vrot.slane %v6234_v8, %v6248_v23 }
  0x65   : > { %1169 = vmatpush1.bf16.msra.mxu1 %v5534_v30 }
  0x66   : > { %1128 = vmatpush1.bf16.msra.mxu0 %v5535_v31  ;;  %1170 = vmatprep.subr.bf16.mxu1 %v5536_v32  ;;  %v5584_v32 = vld [vmem:[#allocation2 + $0x160] ss:$24 sps:$4 sm:$0xff]  }
  0x67   : > { %1129 = vmatprep.subr.bf16.mxu0 %v5538_v33  ;;  %v5586_v33 = vld [vmem:[#allocation2 + $0x164] ss:$24 sps:$4 sm:$0xff]  }
  0x69   : > { %1171 = vmatpush2.bf16.msra.mxu1 %v5540_v34  ;;  %v5589_v34 = vld [vmem:[#allocation2 + $0x134] ss:$24 sps:$4 sm:$0xff]  }
  0x6a   : > { %1130 = vmatpush2.bf16.msra.mxu0 %v5541_v35  ;;  %1172 = vmatprep.subr.bf16.mxu1 %v5542_v36  ;;  %v5587_v35 = vld [vmem:[#allocation2 + $0x130] ss:$24 sps:$4 sm:$0xff]   ;;  %v5592_v36 = vld [vmem:[#allocation2 + $0x104] ss:$24 sps:$4 sm:$0xff]  }
  0x6b   : > { %1131 = vmatprep.subr.bf16.mxu0 %v5544_v37  ;;  %v5590_v37 = vld [vmem:[#allocation2 + $0x100] ss:$24 sps:$4 sm:$0xff]  }
  0x6d   : > { %1173 = vmatpush2.bf16.msra.mxu1 %v5546_v38  ;;  %v5595_v38 = vld [vmem:[#allocation2 + $0xd4] ss:$24 sps:$4 sm:$0xff]  }
  0x6e   : > { %1132 = vmatpush2.bf16.msra.mxu0 %v5547_v39  ;;  %1174 = vmatprep.subr.bf16.mxu1 %v5548_v40  ;;  %v5593_v39 = vld [vmem:[#allocation2 + $0xd0] ss:$24 sps:$4 sm:$0xff]   ;;  %v5598_v40 = vld [vmem:[#allocation2 + $0xa4] ss:$24 sps:$4 sm:$0xff]  }
  0x6f   : > { %1133 = vmatprep.subr.bf16.mxu0 %v5550_v41  ;;  %v5596_v41 = vld [vmem:[#allocation2 + $0xa0] ss:$24 sps:$4 sm:$0xff]  }
  0x71   : > { %1175 = vmatpush2.bf16.msra.mxu1 %v5552_v42  ;;  %v5599_v42 = vld [vmem:[#allocation2 + $0x70] ss:$24 sps:$4 sm:$0xff]  }
  0x72   : > { %1134 = vmatpush2.bf16.msra.mxu0 %v5553_v43  ;;  %1176 = vmatprep.subr.bf16.mxu1 %v5554_v44  ;;  %v5601_v43 = vld [vmem:[#allocation2 + $0x74] ss:$24 sps:$4 sm:$0xff]   ;;  %v5602_v44 = vld [vmem:[#allocation2 + $0x40] ss:$24 sps:$4 sm:$0xff]  }
  0x73   : > { %1135 = vmatprep.subr.bf16.mxu0 %v5556_v45  ;;  %v5604_v45 = vld [vmem:[#allocation2 + $0x44] ss:$24 sps:$4 sm:$0xff]  }
  0x75   : > { %1177 = vmatpush2.bf16.msra.mxu1 %v5558_v46  ;;  %v5607_v46 = vld [vmem:[#allocation2 + $0x14] ss:$24 sps:$4 sm:$0xff]  }
  0x76   : > { %1136 = vmatpush2.bf16.msra.mxu0 %v5559_v47  ;;  %1178 = vmatprep.subr.bf16.mxu1 %v5560_v49  ;;  %v5605_v47 = vld [vmem:[#allocation2 + $0x10] ss:$24 sps:$4 sm:$0xff]   ;;  %v5608_v49 = vld [vmem:[#allocation2 + $0x2e0] ss:$24 sps:$4 sm:$0xff]  }
  0x77   : > { %1137 = vmatprep.subr.bf16.mxu0 %v5562_v50  ;;  %v5613_v50 = vld [vmem:[#allocation2 + $0x2b4] ss:$24 sps:$4 sm:$0xff]  }
  0x79   : > { %1179 = vmatpush2.bf16.msra.mxu1 %v5564_v52  ;;  %v5616_v52 = vld [vmem:[#allocation2 + $0x284] ss:$24 sps:$4 sm:$0xff]  }
  0x7a   : > { %1138 = vmatpush2.bf16.msra.mxu0 %v5565_v53  ;;  %1180 = vmatprep.subr.bf16.mxu1 %v5566_v54  ;;  %v5614_v53 = vld [vmem:[#allocation2 + $0x280] ss:$24 sps:$4 sm:$0xff]   ;;  %v5619_v54 = vld [vmem:[#allocation2 + $0x254] ss:$24 sps:$4 sm:$0xff]  }
  0x7b   : > { %1139 = vmatprep.subr.bf16.mxu0 %v5568_v55  ;;  %v5617_v55 = vld [vmem:[#allocation2 + $0x250] ss:$24 sps:$4 sm:$0xff]  }
  0x7d   : > { %1181 = vmatpush2.bf16.msra.mxu1 %v5570_v56  ;;  %v5622_v56 = vld [vmem:[#allocation2 + $0x224] ss:$24 sps:$4 sm:$0xff]  }
  0x7e   : > { %1140 = vmatpush2.bf16.msra.mxu0 %v5571_v57  ;;  %1182 = vmatprep.subr.bf16.mxu1 %v5572_v58  ;;  %v5620_v57 = vld [vmem:[#allocation2 + $0x220] ss:$24 sps:$4 sm:$0xff]   ;;  %v5625_v58 = vld [vmem:[#allocation2 + $0x1f4] ss:$24 sps:$4 sm:$0xff]  }
  0x7f   : > { %1141 = vmatprep.subr.bf16.mxu0 %v5574_v59  ;;  %v5623_v59 = vld [vmem:[#allocation2 + $0x1f0] ss:$24 sps:$4 sm:$0xff]  }
  0x81   : > { %1183 = vmatpush2.bf16.msra.mxu1 %v5576_v60  ;;  %v5628_v60 = vld [vmem:[#allocation2 + $0x1c4] ss:$24 sps:$4 sm:$0xff]  }
  0x82   : > { %1142 = vmatpush2.bf16.msra.mxu0 %v5577_v61  ;;  %1184 = vmatprep.subr.bf16.mxu1 %v5578_v62  ;;  %v5626_v61 = vld [vmem:[#allocation2 + $0x1c0] ss:$24 sps:$4 sm:$0xff]   ;;  %v5631_v62 = vld [vmem:[#allocation2 + $0x194] ss:$24 sps:$4 sm:$0xff]  }
  0x83   : > { %1143 = vmatprep.subr.bf16.mxu0 %v5580_v63 }
  0x85   : > { %1185 = vmatpush2.bf16.msra.mxu1 %v5582_v0 }
  0x86   : > { %1144 = vmatpush2.bf16.msra.mxu0 %v5583_v1  ;;  %5331 = vmatprep.subr.bf16.mxu1 %v6044_v4  ;;  %v5629_v1 = vld [vmem:[#allocation2 + $0x190] ss:$24 sps:$4 sm:$0xff]  }
  0x87   : > { %1195 = vmatprep.subr.bf16.mxu0 %v5586_v33 }
  0x88   : > { %1187 = vmatmul.mubr.bf16.vlgmr.msra.gmra.mxu1 %v6221_v3 }
  0x89   : > { %1146 = vmatmul.mubr.bf16.vlgmr.msra.gmra.mxu0 %v6221_v3  ;;  %5333 = vmatprep.mubr.msk.bf16.mxu1 %vm6045_vm0, %v6044_v4 }
  0x8a   : > { %1227 = vmatprep.mubr.bf16.mxu0 %v504_v51  ;;  %1196 = vmatpush1.bf16.msra.mxu0 %v5584_v32  ;;  %v5611_v51 = vld [vmem:[#allocation2 + $0x2b0] ss:$24 sps:$4 sm:$0xff]  }
  0x8b   : > { %1197 = vmatprep.subr.bf16.mxu0 %v5589_v34 }
  0x8e   : > { %1198 = vmatpush1.bf16.msra.mxu0 %v5587_v35 }
  0x8f   : > { %1199 = vmatprep.subr.bf16.mxu0 %v5592_v36 }
  0x92   : > { %1200 = vmatpush1.bf16.msra.mxu0 %v5590_v37 }
  0x93   : > { %1201 = vmatprep.subr.bf16.mxu0 %v5595_v38 }
  0x96   : > { %1202 = vmatpush1.bf16.msra.mxu0 %v5593_v39 }
  0x97   : > { %1203 = vmatprep.subr.bf16.mxu0 %v5598_v40 }
  0x9a   : > { %1204 = vmatpush1.bf16.msra.mxu0 %v5596_v41 }
  0x9b   : > { %1205 = vmatprep.subr.bf16.mxu0 %v5601_v43 }
  0x9e   : > { %1206 = vmatpush1.bf16.msra.mxu0 %v5599_v42 }
  0x9f   : > { %1207 = vmatprep.subr.bf16.mxu0 %v5604_v45 }
  0xa2   : > { %1208 = vmatpush1.bf16.msra.mxu0 %v5602_v44 }
  0xa3   : > { %1209 = vmatprep.subr.bf16.mxu0 %v5607_v46 }
  0xa6   : > { %1210 = vmatpush1.bf16.msra.mxu0 %v5605_v47 }
  0xa7   : > { %1211 = vmatprep.subr.bf16.mxu0 %v5610_v48 }
  0xaa   : > { %1212 = vmatpush2.bf16.msra.mxu0 %v5608_v49 }
  0xab   : > { %1213 = vmatprep.subr.bf16.mxu0 %v5613_v50 }
  0xae   : > { %1214 = vmatpush2.bf16.msra.mxu0 %v5611_v51 }
  0xaf   : > { %1215 = vmatprep.subr.bf16.mxu0 %v5616_v52 }
  0xb2   : > { %1216 = vmatpush2.bf16.msra.mxu0 %v5614_v53  ;;  %v621_v53 = vsub.s32 4, %v6228_v6 }
  0xb3   : > { %1217 = vmatprep.subr.bf16.mxu0 %v5619_v54 }
  0xb6   : > { %1218 = vmatpush2.bf16.msra.mxu0 %v5617_v55 }
  0xb7   : > { %1219 = vmatprep.subr.bf16.mxu0 %v5622_v56 }
  0xba   : > { %1220 = vmatpush2.bf16.msra.mxu0 %v5620_v57 }
  0xbb   : > { %1221 = vmatprep.subr.bf16.mxu0 %v5625_v58 }
  0xbe   : > { %1222 = vmatpush2.bf16.msra.mxu0 %v5623_v59  ;;  %v622_v59 = vrot.slane %v6234_v8, %v621_v53 }
  0xbf   : > { %1223 = vmatprep.subr.bf16.mxu0 %v5628_v60 }
  0xc2   : > { %1224 = vmatpush2.bf16.msra.mxu0 %v5626_v61 }
  0xc3   : > { %1225 = vmatprep.subr.bf16.mxu0 %v5631_v62 }
  0xc6   : > { %1226 = vmatpush2.bf16.msra.mxu0 %v5629_v1 }
  0xc7   : > { %5379 = vmatprep.subr.bf16.mxu0 %v6044_v4 }
  0xc9   : > { %1228 = vmatmul.mubr.bf16.vlgmr.msra.gmra.mxu0 %v6221_v3 }
  0xca   : > { %5381 = vmatprep.mubr.msk.bf16.mxu0 %vm6045_vm0, %v6044_v4 }
 0x148   : > { %v1188_v12 = vpop.f32.mrf.mxu1 }
 0x149   : > { %v1147_v13 = vpop.f32.mrf.mxu0  ;;  %v1189_v14 = vadd.f32 %v1188_v12, %v614_v10 }
 0x14a   : > { %v1190_v15 = vpop.f32.mrf.mxu1  ;;  %v1148_v17 = vadd.f32 %v1147_v13, %v606_v11 }
 0x14b   : > { %v1149_v16 = vpop.f32.mrf.mxu0  ;;  %1268 = vrot.lane.b32.xlu1 %v1189_v14, %s6046_s18  ;;  %1265 = vrot.lane.b32.xlu0 %v1189_v14, %s6047_s21  ;;  %v1312_v18 = vpack.c.bf16 %v1189_v14, %v1189_v14  ;;  %v6261_v30 = vadd.f32 %v1190_v15, %v618_v28 }
 0x14c   : > { %v1192_v19 = vpop.f32.mrf.mxu1  ;;  %v1256_v21 = vmul.f32 0.17677669, %v1148_v17  ;;  %v6263_v31 = vadd.f32 %v1149_v16, %v610_v29 }
 0x14d   : > { %v1151_v20 = vpop.f32.mrf.mxu0  ;;  %v1325_v24 = vsel %vm1320_vm1, %v1312_v18, 0 }
 0x14e   : > { %v1193_v25 = vpop.f32.mrf.mxu1  ;;  %5332 = vmatpush3.bf16.xpose.msra.mxu1 %v1325_v24  ;;  %v1304_v27 = vpack.c.bf16 %v1256_v21, %v1256_v21  ;;  %v1316_v24 = vpack.c.bf16 %v6261_v30, %v6261_v30  ;;  %v1260_v28 = vmul.f32 0.17677669, %v6263_v31 }
 0x14f   : > { %v1152_v26 = vpop.f32.mrf.mxu0  ;;  %1240 = vrot.lane.b32.xlu1 %v1148_v17, %s6046_s18  ;;  %1237 = vrot.lane.b32.xlu0 %v1148_v17, %s6047_s21 }
 0x150   : > { %5337 = vmatprep.subr.bf16.mxu1 %v6044_v4  ;;  %v1509_v26 = vsel %vm1320_vm1, %v1316_v24, 0  ;;  %v1308_v32 = vpack.c.bf16 %v1260_v28, %v1260_v28 }
 0x153   : > { %1243 = vrot.lane.b32.xlu1 %v1148_v17, %s6048_s22  ;;  %1271 = vrot.lane.b32.xlu0 %v1189_v14, %s6048_s22 }
 0x155   : > { %5334 = vmatmul.mubr.msk.bf16.vlgmr.msra.gmra.mxu1 %vm1320_vm1, %v1304_v27 }
 0x156   : > { %5339 = vmatprep.mubr.msk.bf16.mxu1 %vm6045_vm0, %v6044_v4 }
 0x157   : > { %1247 = vrot.lane.b32.xlu1 %v6263_v31, %s6047_s21  ;;  %1275 = vrot.lane.b32.xlu0 %v6261_v30, %s6047_s21 }
 0x15b   : > { %1250 = vrot.lane.b32.xlu1 %v6263_v31, %s6046_s18  ;;  %1278 = vrot.lane.b32.xlu0 %v6261_v30, %s6046_s18 }
 0x15f   : > { %1253 = vrot.lane.b32.xlu1 %v6263_v31, %s6048_s22  ;;  %1281 = vrot.lane.b32.xlu0 %v6261_v30, %s6048_s22 }
 0x189   : > { %v1229_v52 = vpop.f32.mrf.mxu0 }
 0x18b   : > { %v6324_v54 = vpop.f32.mrf.mxu0 }
 0x18d   : > { %v1233_v57 = vpop.f32.mrf.mxu0 }
 0x18f   : > { %v1234_v60 = vpop.f32.mrf.mxu0 }
 0x190   : > { %v625_v60 = vsub.s32 5, %v6228_v6 }
 0x1bd   : > { %v1266_v63 = vpop.permute.xlu0 %1265  ;;  %v1269_v5 = vpop.permute.xlu1 %1268 }
 0x1be   : > { %v1313_v0 = vpack.c.bf16 %v1266_v63, %v1266_v63  ;;  %v1314_v12 = vpack.c.bf16 %v1269_v5, %v1269_v5  ;;  %v6330_v63 = vadd.f32 %v1229_v52, %v622_v59 }
 0x1c0   : > { %v1371_v2 = vsel %vm1320_vm1, %v1313_v0, 0  ;;  %v1417_v14 = vsel %vm1320_vm1, %v1314_v12, 0 }
 0x1c1   : > { %v1238_v10 = vpop.permute.xlu0 %1237  ;;  %5338 = vmatpush3.bf16.xpose.msra.mxu1 %v1371_v2  ;;  %v1241_v15 = vpop.permute.xlu1 %1240  ;;  %v1786_v2 = vpack.c.bf16 %v6330_v63, %v6330_v63 }
 0x1c2   : > { %v1257_v11 = vmul.f32 0.17677669, %v1238_v10  ;;  %5343 = vmatprep.subr.bf16.mxu1 %v6044_v4  ;;  %v1258_v17 = vmul.f32 0.17677669, %v1241_v15 }
 0x1c3   : > { %v1799_v10 = vsel %vm1797_vm3, %v1786_v2, 0 }
 0x1c4   : > { %v1305_v13 = vpack.c.bf16 %v1257_v11, %v1257_v11  ;;  %v1306_v19 = vpack.c.bf16 %v1258_v17, %v1258_v17  ;;  %5380 = vmatpush3.bf16.msra.mxu0 %v1799_v10 }
 0x1c5   : > { %v1272_v16 = vpop.permute.xlu0 %1271  ;;  %v1244_v20 = vpop.permute.xlu1 %1243  ;;  %5391 = vmatprep.subr.bf16.mxu0 %v6044_v4 }
 0x1c6   : > { %v1315_v18 = vpack.c.bf16 %v1272_v16, %v1272_v16  ;;  %v1259_v21 = vmul.f32 0.17677669, %v1244_v20 }
 0x1c8   : > { %5340 = vmatmul.mubr.msk.bf16.vlgmr.msra.gmra.mxu1 %vm1320_vm1, %v1305_v13  ;;  %v1463_v3 = vsel %vm1320_vm1, %v1315_v18, 0  ;;  %v1307_v25 = vpack.c.bf16 %v1259_v21, %v1259_v21 }
 0x1c9   : > { %5344 = vmatpush3.bf16.xpose.msra.mxu1 %v1417_v14  ;;  %5345 = vmatprep.mubr.msk.bf16.mxu1 %vm6045_vm0, %v6044_v4  ;;  %v1276_v27 = vpop.permute.xlu0 %1275  ;;  %v1248_v33 = vpop.permute.xlu1 %1247 }
 0x1ca   : > { %5349 = vmatprep.subr.bf16.mxu1 %v6044_v4  ;;  %v1317_v29 = vpack.c.bf16 %v1276_v27, %v1276_v27  ;;  %v1261_v35 = vmul.f32 0.17677669, %v1248_v33 }
 0x1cc   : > { %v1555_v34 = vsel %vm1320_vm1, %v1317_v29, 0  ;;  %v1309_v37 = vpack.c.bf16 %v1261_v35, %v1261_v35 }
 0x1cd   : > { %v1279_v30 = vpop.permute.xlu0 %1278  ;;  %v1251_v31 = vpop.permute.xlu1 %1250 }
 0x1ce   : > { %v1318_v36 = vpack.c.bf16 %v1279_v30, %v1279_v30  ;;  %v1262_v40 = vmul.f32 0.17677669, %v1251_v31 }
 0x1d0   : > { %5346 = vmatmul.mubr.msk.bf16.vlgmr.msra.gmra.mxu1 %vm1320_vm1, %v1306_v19  ;;  %v1601_v38 = vsel %vm1320_vm1, %v1318_v36, 0  ;;  %v1310_v42 = vpack.c.bf16 %v1262_v40, %v1262_v40 }
 0x1d1   : > { %5350 = vmatpush3.bf16.xpose.msra.mxu1 %v1463_v3  ;;  %5351 = vmatprep.mubr.msk.bf16.mxu1 %vm6045_vm0, %v6044_v4  ;;  %v1282_v39 = vpop.permute.xlu0 %1281  ;;  %v1254_v43 = vpop.permute.xlu1 %1253 }
 0x1d2   : > { %5355 = vmatprep.subr.bf16.mxu1 %v6044_v4  ;;  %v1319_v41 = vpack.c.bf16 %v1282_v39, %v1282_v39  ;;  %v1263_v45 = vmul.f32 0.17677669, %v1254_v43 }
 0x1d4   : > { %v1647_v44 = vsel %vm1320_vm1, %v1319_v41, 0  ;;  %v1311_v46 = vpack.c.bf16 %v1263_v45, %v1263_v45 }
 0x1d8   : > { %5352 = vmatmul.mubr.msk.bf16.vlgmr.msra.gmra.mxu1 %vm1320_vm1, %v1307_v25 }
 0x1d9   : > { %5356 = vmatpush3.bf16.xpose.msra.mxu1 %v1509_v26  ;;  %5357 = vmatprep.mubr.msk.bf16.mxu1 %vm6045_vm0, %v6044_v4 }
 0x1da   : > { %5361 = vmatprep.subr.bf16.mxu1 %v6044_v4 }
 0x1e0   : > { %5358 = vmatmul.mubr.msk.bf16.vlgmr.msra.gmra.mxu1 %vm1320_vm1, %v1308_v32 }
 0x1e1   : > { %5362 = vmatpush3.bf16.xpose.msra.mxu1 %v1555_v34  ;;  %5363 = vmatprep.mubr.msk.bf16.mxu1 %vm6045_vm0, %v6044_v4 }
 0x1e2   : > { %5367 = vmatprep.subr.bf16.mxu1 %v6044_v4 }
 0x1e8   : > { %5364 = vmatmul.mubr.msk.bf16.vlgmr.msra.gmra.mxu1 %vm1320_vm1, %v1309_v37 }
 0x1e9   : > { %5368 = vmatpush3.bf16.xpose.msra.mxu1 %v1601_v38  ;;  %5369 = vmatprep.mubr.msk.bf16.mxu1 %vm6045_vm0, %v6044_v4 }
 0x1ea   : > { %5373 = vmatprep.subr.bf16.mxu1 %v6044_v4 }
 0x1f0   : > { %5370 = vmatmul.mubr.msk.bf16.vlgmr.msra.gmra.mxu1 %vm1320_vm1, %v1310_v42 }
 0x1f1   : > { %5374 = vmatpush3.bf16.xpose.msra.mxu1 %v1647_v44  ;;  %5375 = vmatprep.mubr.msk.bf16.mxu1 %vm6045_vm0, %v6044_v4 }
 0x1f2   : > { %5385 = vmatprep.subr.bf16.mxu1 %v6044_v4 }
 0x1f8   : > { %5376 = vmatmul.mubr.msk.bf16.vlgmr.msra.gmra.mxu1 %vm1320_vm1, %v1311_v46 }
 0x1f9   : > { %5387 = vmatprep.mubr.msk.bf16.mxu1 %vm6045_vm0, %v6044_v4 }
 0x215   : > { %v1361_v47 = vpop.f32.mrf.mxu1 }
 0x216   : > { %v1690_v48 = vsel %vm1689_vm2, %v1361_v47, -inf }
 0x217   : > { %1691 = vmax.xlane.f32.xlu0 %v1690_v48  ;;  %v5335_v49 = vpop.f32.mrf.mxu1 }
 0x219   : > { %v1364_v50 = vpop.f32.mrf.mxu1 }
 0x21b   : > { %v5336_v51 = vpop.f32.mrf.mxu1 }
 0x288   : > { %v1407_v55 = vpop.f32.mrf.mxu1 }
 0x289   : > { %v1693_v56 = vsel %vm1689_vm2, %v1407_v55, -inf }
 0x28a   : > { %1694 = vmax.xlane.f32.xlu1 %v1693_v56  ;;  %v5341_v58 = vpop.f32.mrf.mxu1 }
 0x28c   : > { %v1410_v61 = vpop.f32.mrf.mxu1 }
 0x28e   : > { %v5342_v62 = vpop.f32.mrf.mxu1 }
 0x290   : > { %v1453_v0 = vpop.f32.mrf.mxu1 }
 0x291   : > { %v1696_v1 = vsel %vm1689_vm2, %v1453_v0, -inf }
 0x292   : > { %1697 = vmax.xlane.f32.xlu0 %v1696_v1  ;;  %v5347_v5 = vpop.f32.mrf.mxu1 }
 0x294   : > { %v1456_v11 = vpop.f32.mrf.mxu1 }
 0x296   : > { %v5348_v12 = vpop.f32.mrf.mxu1 }
 0x298   : > { %v1499_v13 = vpop.f32.mrf.mxu1 }
 0x299   : > { %v1699_v14 = vsel %vm1689_vm2, %v1499_v13, -inf }
 0x29a   : > { %1700 = vmax.xlane.f32.xlu0 %v1699_v14  ;;  %v5353_v15 = vpop.f32.mrf.mxu1 }
 0x29c   : > { %v1502_v16 = vpop.f32.mrf.mxu1 }
 0x29e   : > { %v5354_v17 = vpop.f32.mrf.mxu1 }
 0x2a0   : > { %v1692_v18 = vpop.xlane.xlu0 %1691  ;;  %v6338_v19 = vpop.f32.mrf.mxu1 }
 0x2a1   : > { %v1714_v20 = vsub.f32 %v1361_v47, %v1692_v18  ;;  %v1702_v3 = vsel %vm1689_vm2, %v6338_v19, -inf }
 0x2a2   : > { %1703 = vmax.xlane.f32.xlu1 %v1702_v3  ;;  %v5359_v21 = vpop.f32.mrf.mxu1 }
 0x2a3   : > { %v1722_v24 = vmul.f32 1.442695, %v1714_v20 }
 0x2a4   : > { %v1548_v25 = vpop.f32.mrf.mxu1 }
 0x2a5   : > { %5872 = vpow2.f32 %v1722_v24 }
 0x2a6   : > { %v5360_v26 = vpop.f32.mrf.mxu1 }
 0x2a8   : > { %v6342_v27 = vpop.f32.mrf.mxu1 }
 0x2a9   : > { %v1705_v28 = vsel %vm1689_vm2, %v6342_v27, -inf }
 0x2aa   : > { %1706 = vmax.xlane.f32.xlu0 %v1705_v28  ;;  %v5365_v29 = vpop.f32.mrf.mxu1 }
 0x2ac   : > { %v1594_v32 = vpop.f32.mrf.mxu1 }
 0x2ae   : > { %v5366_v33 = vpop.f32.mrf.mxu1 }
 0x2b0   : > { %v6346_v34 = vpop.f32.mrf.mxu1 }
 0x2b1   : > { %v1708_v30 = vsel %vm1689_vm2, %v6346_v34, -inf }
 0x2b2   : > { %v5873_v35 = vpop.eup %5872  ;;  %1709 = vmax.xlane.f32.xlu1 %v1708_v30  ;;  %v5371_v36 = vpop.f32.mrf.mxu1 }
 0x2b3   : > { %v1738_v31 = vsel %vm1689_vm2, %v5873_v35, 0.0 }
 0x2b4   : > { %v1640_v37 = vpop.f32.mrf.mxu1 }
 0x2b6   : > { %1739 = vadd.xlane.f32.xlu1 %v1738_v31  ;;  %v5372_v38 = vpop.f32.mrf.mxu1 }
 0x2b8   : > { %v6351_v39 = vpop.f32.mrf.mxu1 }
 0x2b9   : > { %v1711_v40 = vsel %vm1689_vm2, %v6351_v39, -inf }
 0x2ba   : > { %1712 = vmax.xlane.f32.xlu0 %v1711_v40  ;;  %v5377_v41 = vpop.f32.mrf.mxu1 }
 0x2bc   : > { %v1686_v42 = vpop.f32.mrf.mxu1 }
 0x2be   : > { %v5378_v43 = vpop.f32.mrf.mxu1 }
 0x2c7   : > { %1288 = vrot.lane.b32.xlu1 %v6330_v63, %s6046_s18 }
 0x2d0   : > { %1285 = vrot.lane.b32.xlu0 %v6330_v63, %s6047_s21 }
 0x313   : > { %v1695_v44 = vpop.xlane.xlu1 %1694 }
 0x314   : > { %v1715_v45 = vsub.f32 %v1407_v55, %v1695_v44 }
 0x316   : > { %v1724_v46 = vmul.f32 1.442695, %v1715_v45 }
 0x318   : > { %5874 = vpow2.f32 %v1724_v46 }
 0x31b   : > { %v1698_v47 = vpop.xlane.xlu0 %1697 }
 0x31c   : > { %v1716_v48 = vsub.f32 %v1453_v0, %v1698_v47  ;;  %v626_v0 = vrot.slane %v6234_v8, %v625_v60 }
 0x31e   : > { %v1726_v49 = vmul.f32 1.442695, %v1716_v48  ;;  %v6376_v2 = vadd.f32 %v6324_v54, %v626_v0 }
 0x320   : > { %5876 = vpow2.f32 %v1726_v49  ;;  %v1790_v46 = vpack.c.bf16 %v6376_v2, %v6376_v2 }
 0x322   : > { %v1983_v48 = vsel %vm1797_vm3, %v1790_v46, 0  ;;  %v5653_v46 = vld [vmem:[#allocation4 + $0x60] ss:$8 sps:$4 sm:$0xff]  }
 0x323   : > { %v1701_v50 = vpop.xlane.xlu0 %1700 }
 0x324   : > { %v1717_v51 = vsub.f32 %v1499_v13, %v1701_v50 }
 0x325   : > { %v6359_v52 = vpop.eup %5874 }
 0x326   : > { %v1728_v56 = vmul.f32 1.442695, %v1717_v51  ;;  %v1741_v57 = vsel %vm1689_vm2, %v6359_v52, 0.0 }
 0x327   : > { %1742 = vadd.xlane.f32.xlu0 %v1741_v57 }
 0x328   : > { %5878 = vpow2.f32 %v1728_v56 }
 0x32b   : > { %v1704_v62 = vpop.xlane.xlu1 %1703 }
 0x32c   : > { %v1718_v16 = vsub.f32 %v6338_v19, %v1704_v62 }
 0x32d   : > { %v6363_v58 = vpop.eup %5876 }
 0x32e   : > { %v1744_v55 = vsel %vm1689_vm2, %v6363_v58, 0.0  ;;  %v1730_v17 = vmul.f32 1.442695, %v1718_v16 }
 0x32f   : > { %1745 = vadd.xlane.f32.xlu1 %v1744_v55 }
 0x333   : > { %v1707_v5 = vpop.xlane.xlu0 %1706 }
 0x334   : > { %v1719_v24 = vsub.f32 %v6342_v27, %v1707_v5 }
 0x335   : > { %v6367_v59 = vpop.eup %5878 }
 0x336   : > { %v1747_v61 = vsel %vm1689_vm2, %v6367_v59, 0.0 }
 0x337   : > { %1748 = vadd.xlane.f32.xlu0 %v1747_v61 }
 0x33b   : > { %v1710_v1 = vpop.xlane.xlu1 %1709 }
 0x33c   : > { %v1720_v18 = vsub.f32 %v6346_v34, %v1710_v1 }
 0x33e   : > { %v1734_v25 = vmul.f32 1.442695, %v1720_v18 }
 0x33f   : > { %v1740_v10 = vpop.xlane.xlu1 %1739 }
 0x340   : > { %1295 = vrot.lane.b32.xlu1 %v6376_v2, %s6047_s21  ;;  %5880 = vrcp.f32 %v1740_v10  ;;  %v5634_v10 = vld [vmem:[#allocation4 + $0x14] ss:$8 sps:$4 sm:$0xff]  }
 0x341   : > { %5882 = vpow2.f32 %v1730_v17 }
 0x342   : > { %5884 = vpow2.f32 %v1734_v25  ;;  %v5635_v25 = vld [vmem:[#allocation4] ss:$8 sps:$4 sm:$0xff]  }
 0x343   : > { %v1713_v11 = vpop.xlane.xlu0 %1712  ;;  %v1289_v14 = vpop.permute.xlu1 %1288 }
 0x344   : > { %v1788_v8 = vpack.c.bf16 %v1289_v14, %v1289_v14  ;;  %v1721_v19 = vsub.f32 %v6351_v39, %v1713_v11 }
 0x346   : > { %v1891_v21 = vsel %vm1797_vm3, %v1788_v8, 0  ;;  %v1736_v26 = vmul.f32 1.442695, %v1721_v19  ;;  %v5646_v19 = vld [vmem:[#allocation4 + $0x54] ss:$8 sps:$4 sm:$0xff]  }
 0x347   : > { %v1286_v12 = vpop.permute.xlu0 %1285 }
 0x348   : > { %v1787_v13 = vpack.c.bf16 %v1286_v12, %v1286_v12 }
 0x34a   : > { %v1845_v15 = vsel %vm1797_vm3, %v1787_v13, 0 }
 0x34b   : > { %5386 = vmatpush3.bf16.msra.mxu1 %v1845_v15 }
 0x34c   : > { %5397 = vmatprep.subr.bf16.mxu1 %v6044_v4 }
 0x34d   : > { %1291 = vrot.lane.b32.xlu0 %v6330_v63, %s6048_s22  ;;  %v5881_v54 = vpop.eup %5880  ;;  %v1732_v63 = vmul.f32 1.442695, %v1719_v24 }
 0x34e   : > { %v1770_v20 = vmul.f32 %v5881_v54, %v5873_v35  ;;  %v5883_v28 = vpop.eup %5882  ;;  %v5632_v54 = vld [vmem:[#allocation4 + $0x10] ss:$8 sps:$4 sm:$0xff]  }
 0x34f   : > { %5886 = vpow2.f32 %v1732_v63  ;;  %v1750_v27 = vsel %vm1689_vm2, %v5883_v28, 0.0  ;;  %v6394_v29 = vpop.eup %5884 }
 0x350   : > { %v1778_v3 = vpack.c.bf16 %v1770_v20, %v1770_v20  ;;  %5888 = vpow2.f32 %v1736_v26  ;;  %v1756_v33 = vsel %vm1689_vm2, %v6394_v29, 0.0  ;;  %v5637_v20 = vld [vmem:[#allocation4 + $0x4] ss:$8 sps:$4 sm:$0xff]   ;;  %v6049_v26 = vmov 0  }
 0x352   : > { %5382 = vmatmul.mubr.msk.bf16.vlgmr.msra.gmra.mxu0 %vm1689_vm2, %v1778_v3 }
 0x353   : > { %5392 = vmatpush3.bf16.msra.mxu0 %v1891_v21  ;;  %5393 = vmatprep.mubr.msk.bf16.mxu0 %vm6045_vm0, %v6044_v4  ;;  %v5640_v21 = vld [vmem:[#allocation4 + $0x34] ss:$8 sps:$4 sm:$0xff]  }
 0x354   : > { %5403 = vmatprep.subr.bf16.mxu0 %v6044_v4 }
 0x35c   : > { %v6396_v32 = vpop.eup %5886 }
 0x35d   : > { %v6400_v34 = vpop.eup %5888  ;;  %v1753_v30 = vsel %vm1689_vm2, %v6396_v32, 0.0 }
 0x35e   : > { %v1759_v35 = vsel %vm1689_vm2, %v6400_v34, 0.0 }
 0x364   : > { %1751 = vadd.xlane.f32.xlu1 %v1750_v27 }
 0x368   : > { %1757 = vadd.xlane.f32.xlu1 %v1756_v33  ;;  %v5644_v33 = vld [vmem:[#allocation4 + $0x50] ss:$8 sps:$4 sm:$0xff]  }
 0x36c   : > { %1754 = vadd.xlane.f32.xlu0 %v1753_v30  ;;  %1760 = vadd.xlane.f32.xlu1 %v1759_v35  ;;  %v5649_v30 = vld [vmem:[#allocation4 + $0x44] ss:$8 sps:$4 sm:$0xff]   ;;  %v5652_v35 = vld [vmem:[#allocation4 + $0x74] ss:$8 sps:$4 sm:$0xff]  }
 0x37d   : > { %1301 = vrot.lane.b32.xlu1 %v6376_v2, %s6048_s22 }
 0x382   : > { %1298 = vrot.lane.b32.xlu0 %v6376_v2, %s6046_s18 }
 0x3b0   : > { %v1743_v36 = vpop.xlane.xlu0 %1742 }
 0x3b1   : > { %5890 = vrcp.f32 %v1743_v36 }
 0x3b8   : > { %v1746_v37 = vpop.xlane.xlu1 %1745 }
 0x3b9   : > { %5892 = vrcp.f32 %v1746_v37 }
 0x3bc   : > { %v1296_v49 = vpop.permute.xlu1 %1295 }
 0x3bd   : > { %v1791_v51 = vpack.c.bf16 %v1296_v49, %v1296_v49 }
 0x3be   : > { %v5891_v31 = vpop.eup %5890 }
 0x3bf   : > { %v1771_v38 = vmul.f32 %v5891_v31, %v6359_v52  ;;  %v2029_v57 = vsel %vm1797_vm3, %v1791_v51, 0  ;;  %v5647_v31 = vld [vmem:[#allocation4 + $0x40] ss:$8 sps:$4 sm:$0xff]  }
 0x3c0   : > { %v1749_v39 = vpop.xlane.xlu0 %1748 }
 0x3c1   : > { %5894 = vrcp.f32 %v1749_v39  ;;  %v1779_v40 = vpack.c.bf16 %v1771_v38, %v1771_v38  ;;  %v5658_v39 = vld [vmem:[#allocation4 + $0x94] ss:$8 sps:$4 sm:$0xff]  }
 0x3c3   : > { %5388 = vmatmul.mubr.msk.bf16.vlgmr.msra.gmra.mxu1 %vm1689_vm2, %v1779_v40 }
 0x3c4   : > { %v1292_v41 = vpop.permute.xlu0 %1291  ;;  %5399 = vmatprep.mubr.msk.bf16.mxu1 %vm6045_vm0, %v6044_v4 }
 0x3c5   : > { %v1789_v42 = vpack.c.bf16 %v1292_v41, %v1292_v41  ;;  %v5650_v41 = vld [vmem:[#allocation4 + $0x70] ss:$8 sps:$4 sm:$0xff]  }
 0x3c6   : > { %v5893_v43 = vpop.eup %5892 }
 0x3c7   : > { %v1937_v44 = vsel %vm1797_vm3, %v1789_v42, 0  ;;  %v1772_v45 = vmul.f32 %v5893_v43, %v6363_v58  ;;  %v5655_v43 = vld [vmem:[#allocation4 + $0x64] ss:$8 sps:$4 sm:$0xff]  }
 0x3c8   : > { %5398 = vmatpush3.bf16.msra.mxu1 %v1937_v44 }
 0x3c9   : > { %v1780_v47 = vpack.c.bf16 %v1772_v45, %v1772_v45  ;;  %5409 = vmatprep.subr.bf16.mxu1 %v6044_v4 }
 0x3cb   : > { %5394 = vmatmul.mubr.msk.bf16.vlgmr.msra.gmra.mxu0 %vm1689_vm2, %v1780_v47  ;;  %v5664_v47 = vld [vmem:[#allocation4 + $0xb4] ss:$8 sps:$4 sm:$0xff]  }
 0x3cc   : > { %5404 = vmatpush3.bf16.msra.mxu0 %v1983_v48  ;;  %5405 = vmatprep.mubr.msk.bf16.mxu0 %vm6045_vm0, %v6044_v4 }
 0x3cd   : > { %5415 = vmatprep.subr.bf16.mxu0 %v6044_v4 }
 0x3ce   : > { %v5895_v50 = vpop.eup %5894 }
 0x3cf   : > { %v1773_v52 = vmul.f32 %v5895_v50, %v6367_v59  ;;  %v5656_v50 = vld [vmem:[#allocation4 + $0x90] ss:$8 sps:$4 sm:$0xff]  }
 0x3d1   : > { %v1781_v56 = vpack.c.bf16 %v1773_v52, %v1773_v52  ;;  %v5661_v52 = vld [vmem:[#allocation4 + $0x84] ss:$8 sps:$4 sm:$0xff]  }
 0x3d3   : > { %5400 = vmatmul.mubr.msk.bf16.vlgmr.msra.gmra.mxu1 %vm1689_vm2, %v1781_v56 }
 0x3d4   : > { %5410 = vmatpush3.bf16.msra.mxu1 %v2029_v57  ;;  %5411 = vmatprep.mubr.msk.bf16.mxu1 %vm6045_vm0, %v6044_v4 }
 0x3d5   : > { %5421 = vmatprep.subr.bf16.mxu1 %v6044_v4 }
 0x3ed   : > { %v1752_v58 = vpop.xlane.xlu1 %1751 }
 0x3ee   : > { %5896 = vrcp.f32 %v1752_v58  ;;  %v5659_v58 = vld [vmem:[#allocation4 + $0x80] ss:$8 sps:$4 sm:$0xff]  }
 0x3f1   : > { %v1758_v55 = vpop.xlane.xlu1 %1757 }
 0x3f2   : > { %5898 = vrcp.f32 %v1758_v55  ;;  %v5667_v55 = vld [vmem:[#allocation4 + $0xd4] ss:$8 sps:$4 sm:$0xff]  }
 0x3f5   : > { %v1755_v61 = vpop.xlane.xlu0 %1754  ;;  %v1761_v62 = vpop.xlane.xlu1 %1760 }
 0x3f6   : > { %5900 = vrcp.f32 %v1755_v61 }
 0x3f7   : > { %5902 = vrcp.f32 %v1761_v62 }
 0x3f9   : > { %v1299_v0 = vpop.permute.xlu0 %1298  ;;  %v1302_v13 = vpop.permute.xlu1 %1301 }
 0x3fa   : > { %v1792_v1 = vpack.c.bf16 %v1299_v0, %v1299_v0  ;;  %v1793_v16 = vpack.c.bf16 %v1302_v13, %v1302_v13  ;;  %v5662_v0 = vld [vmem:[#allocation4 + $0xb0] ss:$8 sps:$4 sm:$0xff]  }
 0x3fb   : > { %v5897_v59 = vpop.eup %5896 }
 0x3fc   : > { %v1774_v2 = vmul.f32 %v5897_v59, %v5883_v28  ;;  %v2075_v12 = vsel %vm1797_vm3, %v1792_v1, 0  ;;  %v2121_v24 = vsel %vm1797_vm3, %v1793_v16, 0  ;;  %v5638_v28 = vld [vmem:[#allocation4 + $0x30] ss:$8 sps:$4 sm:$0xff]   ;;  %v5670_v1 = vld [vmem:[#allocation4 + $0xa4] ss:$8 sps:$4 sm:$0xff]  }
 0x3fd   : > { %v5673_v16 = vld [vmem:[#allocation4 + $0xc4] ss:$8 sps:$4 sm:$0xff]  }
 0x3fe   : > { %v1782_v5 = vpack.c.bf16 %v1774_v2, %v1774_v2 }
 0x3ff   : > { %v5899_v11 = vpop.eup %5898 }
 0x400   : > { %5406 = vmatmul.mubr.msk.bf16.vlgmr.msra.gmra.mxu0 %vm1689_vm2, %v1782_v5  ;;  %v1776_v14 = vmul.f32 %v5899_v11, %v6394_v29  ;;  %v5643_v29 = vld [vmem:[#allocation4 + $0x24] ss:$8 sps:$4 sm:$0xff]   ;;  %v5676_v11 = vld [vmem:[#allocation4 + $0xf4] ss:$8 sps:$4 sm:$0xff]  }
 0x401   : > { %5416 = vmatpush3.bf16.msra.mxu0 %v2075_v12  ;;  %5417 = vmatprep.mubr.msk.bf16.mxu0 %vm6045_vm0, %v6044_v4 }
 0x402   : > { %2238 = vmatprep.subr.bf16.mxu0 %v5634_v10  ;;  %v1784_v17 = vpack.c.bf16 %v1776_v14, %v1776_v14  ;;  %v5668_v10 = vld [vmem:[#allocation4 + $0xa0] ss:$8 sps:$4 sm:$0xff]   ;;  %v5665_v14 = vld [vmem:[#allocation4 + $0xd0] ss:$8 sps:$4 sm:$0xff]  }
 0x403   : > { %v5901_v15 = vpop.eup %5900 }
 0x404   : > { %v1775_v8 = vmul.f32 %v5901_v15, %v6396_v32  ;;  %v5903_v3 = vpop.eup %5902  ;;  %v5641_v32 = vld [vmem:[#allocation4 + $0x20] ss:$8 sps:$4 sm:$0xff]  }
 0x405   : > { %v1777_v63 = vmul.f32 %v5903_v3, %v6400_v34 }
 0x406   : > { %v1783_v18 = vpack.c.bf16 %v1775_v8, %v1775_v8 }
 0x407   : > { %v1785_v27 = vpack.c.bf16 %v1777_v63, %v1777_v63  ;;  %v5679_v63 = vld [vmem:[#allocation4 + $0xe4] ss:$8 sps:$4 sm:$0xff]  }
 0x408   : > { %5418 = vmatmul.mubr.msk.bf16.vlgmr.msra.gmra.mxu0 %vm1689_vm2, %v1784_v17  ;;  %5412 = vmatmul.mubr.msk.bf16.vlgmr.msra.gmra.mxu1 %vm1689_vm2, %v1783_v18  ;;  %v5671_v17 = vld [vmem:[#allocation4 + $0xc0] ss:$8 sps:$4 sm:$0xff]  }
 0x409   : > { %2239 = vmatpush1.bf16.msra.mxu0 %v5632_v54  ;;  %5422 = vmatpush3.bf16.msra.mxu1 %v2121_v24  ;;  %v5674_v24 = vld [vmem:[#allocation4 + $0xf0] ss:$8 sps:$4 sm:$0xff]  }
 0x40a   : > { %5423 = vmatprep.mubr.msk.bf16.mxu1 %vm6045_vm0, %v6044_v4  ;;  %2240 = vmatprep.subr.bf16.mxu0 %v5637_v20 }
 0x40b   : > { %2258 = vmatprep.mubr.bf16.mxu0 %v6049_v26  ;;  %2302 = vmatprep.subr.bf16.mxu1 %v5640_v21 }
 0x40d   : > { %2241 = vmatpush1.bf16.msra.mxu0 %v5635_v25 }
 0x40e   : > { %2366 = vmatprep.subr.bf16.mxu0 %v5646_v19 }
 0x410   : > { %5424 = vmatmul.mubr.msk.bf16.vlgmr.msra.gmra.mxu1 %vm1689_vm2, %v1785_v27 }
 0x411   : > { %2303 = vmatpush1.bf16.msra.mxu1 %v5638_v28  ;;  %2322 = vmatprep.mubr.bf16.mxu1 %v6049_v26 }
 0x412   : > { %v1835_v4 = vpop.f32.mrf.mxu0  ;;  %2304 = vmatprep.subr.bf16.mxu1 %v5643_v29 }
 0x413   : > { %v2163_v34 = vpack.c.bf16 %v1835_v4, %v1835_v4 }
 0x414   : > { %v5383_v36 = vpop.f32.mrf.mxu0 }
 0x415   : > { %5003 = vmatmul.mubr.msk.bf16.vlgmr.msra.gmra.mxu0 %vm1320_vm1, %v2163_v34  ;;  %2305 = vmatpush1.bf16.msra.mxu1 %v5641_v32  ;;  %v5677_v32 = vld [vmem:[#allocation4 + $0xe0] ss:$8 sps:$4 sm:$0xff]  }
 0x416   : > { %v1838_v37 = vpop.f32.mrf.mxu0  ;;  %2367 = vmatpush1.bf16.msra.mxu0 %v5644_v33  ;;  %2386 = vmatprep.mubr.bf16.mxu0 %v6049_v26 }
 0x417   : > { %2368 = vmatprep.subr.bf16.mxu0 %v5649_v30  ;;  %2430 = vmatprep.subr.bf16.mxu1 %v5652_v35 }
 0x418   : > { %v5384_v38 = vpop.f32.mrf.mxu0 }
 0x41a   : > { %2369 = vmatpush1.bf16.msra.mxu0 %v5647_v31 }
 0x41b   : > { %2494 = vmatprep.subr.bf16.mxu0 %v5658_v39 }
 0x483   : > { %v1881_v40 = vpop.f32.mrf.mxu1 }
 0x484   : > { %v2164_v42 = vpack.c.bf16 %v1881_v40, %v1881_v40 }
 0x485   : > { %v5389_v44 = vpop.f32.mrf.mxu1 }
 0x486   : > { %5008 = vmatmul.mubr.msk.bf16.vlgmr.msra.gmra.mxu1 %vm1320_vm1, %v2164_v42 }
 0x487   : > { %v1884_v45 = vpop.f32.mrf.mxu1  ;;  %2431 = vmatpush1.bf16.msra.mxu1 %v5650_v41  ;;  %2450 = vmatprep.mubr.bf16.mxu1 %v6049_v26 }
 0x488   : > { %2432 = vmatprep.subr.bf16.mxu1 %v5655_v43 }
 0x489   : > { %v5390_v48 = vpop.f32.mrf.mxu1 }
 0x48b   : > { %v1927_v49 = vpop.f32.mrf.mxu0  ;;  %2433 = vmatpush1.bf16.msra.mxu1 %v5653_v46 }
 0x48c   : > { %v2165_v51 = vpack.c.bf16 %v1927_v49, %v1927_v49  ;;  %2558 = vmatprep.subr.bf16.mxu1 %v5664_v47 }
 0x48d   : > { %v5395_v56 = vpop.f32.mrf.mxu0 }
 0x48e   : > { %5013 = vmatmul.mubr.msk.bf16.vlgmr.msra.gmra.mxu0 %vm1320_vm1, %v2165_v51 }
 0x48f   : > { %v1930_v57 = vpop.f32.mrf.mxu0  ;;  %2495 = vmatpush1.bf16.msra.mxu0 %v5656_v50  ;;  %2514 = vmatprep.mubr.bf16.mxu0 %v6049_v26 }
 0x490   : > { %2496 = vmatprep.subr.bf16.mxu0 %v5661_v52 }
 0x491   : > { %v5396_v61 = vpop.f32.mrf.mxu0 }
 0x493   : > { %v1973_v62 = vpop.f32.mrf.mxu1  ;;  %2497 = vmatpush1.bf16.msra.mxu0 %v5659_v58 }
 0x494   : > { %v2166_v59 = vpack.c.bf16 %v1973_v62, %v1973_v62  ;;  %2622 = vmatprep.subr.bf16.mxu0 %v5667_v55 }
 0x495   : > { %v5401_v2 = vpop.f32.mrf.mxu1 }
 0x496   : > { %5018 = vmatmul.mubr.msk.bf16.vlgmr.msra.gmra.mxu1 %vm1320_vm1, %v2166_v59 }
 0x497   : > { %v1976_v5 = vpop.f32.mrf.mxu1  ;;  %2559 = vmatpush1.bf16.msra.mxu1 %v5662_v0  ;;  %2578 = vmatprep.mubr.bf16.mxu1 %v6049_v26 }
 0x498   : > { %2560 = vmatprep.subr.bf16.mxu1 %v5670_v1 }
 0x499   : > { %v5402_v12 = vpop.f32.mrf.mxu1 }
 0x49b   : > { %2561 = vmatpush1.bf16.msra.mxu1 %v5668_v10 }
 0x49c   : > { %2686 = vmatprep.subr.bf16.mxu1 %v5676_v11 }
 0x4c0   : > { %v2019_v13 = vpop.f32.mrf.mxu0 }
 0x4c1   : > { %v2167_v15 = vpack.c.bf16 %v2019_v13, %v2019_v13 }
 0x4c2   : > { %v5407_v8 = vpop.f32.mrf.mxu0 }
 0x4c3   : > { %5023 = vmatmul.mubr.msk.bf16.vlgmr.msra.gmra.mxu0 %vm1320_vm1, %v2167_v15  ;;  %v2729_v8 = vld [vmem:[%s6562_s4] sm:$0x3] }
 0x4c4   : > { %v2022_v54 = vpop.f32.mrf.mxu0  ;;  %2623 = vmatpush1.bf16.msra.mxu0 %v5665_v14  ;;  %2642 = vmatprep.mubr.bf16.mxu0 %v6049_v26 }
 0x4c5   : > { %2624 = vmatprep.subr.bf16.mxu0 %v5673_v16 }
 0x4c6   : > { %v5408_v18 = vpop.f32.mrf.mxu0 }
 0x4c8   : > { %v2111_v20 = vpop.f32.mrf.mxu0  ;;  %2625 = vmatpush1.bf16.msra.mxu0 %v5671_v17  ;;  %v2065_v3 = vpop.f32.mrf.mxu1 }
 0x4c9   : > { %v2169_v21 = vpack.c.bf16 %v2111_v20, %v2111_v20  ;;  %v2168_v25 = vpack.c.bf16 %v2065_v3, %v2065_v3  ;;  %v2734_v3 = vrot.slane %v2729_v8, %v6237_v9 }
 0x4ca   : > { %v5419_v19 = vpop.f32.mrf.mxu0  ;;  %v5413_v28 = vpop.f32.mrf.mxu1 }
 0x4cb   : > { %5033 = vmatmul.mubr.msk.bf16.vlgmr.msra.gmra.mxu0 %vm1320_vm1, %v2169_v21  ;;  %5028 = vmatmul.mubr.msk.bf16.vlgmr.msra.gmra.mxu1 %vm1320_vm1, %v2168_v25  ;;  %v2738_v19 = vrot.slane %v2729_v8, %v6248_v23 }
 0x4cc   : > { %v2114_v27 = vpop.f32.mrf.mxu0  ;;  %v2068_v29 = vpop.f32.mrf.mxu1  ;;  %2687 = vmatpush1.bf16.msra.mxu1 %v5674_v24  ;;  %2706 = vmatprep.mubr.bf16.mxu1 %v6049_v26 }
 0x4cd   : > { %2688 = vmatprep.subr.bf16.mxu1 %v5679_v63 }
 0x4ce   : > { %v5420_v4 = vpop.f32.mrf.mxu0  ;;  %v5414_v33 = vpop.f32.mrf.mxu1 }
 0x4cf   : > { %v5908_v33 = vld [vmem:[%s6217_s20] sm:$0xff] }
 0x4d0   : > { %v2157_v34 = vpop.f32.mrf.mxu1  ;;  %2689 = vmatpush1.bf16.msra.mxu1 %v5677_v32 }
 0x4d1   : > { %v2170_v30 = vpack.c.bf16 %v2157_v34, %v2157_v34 }
 0x4d2   : > { %v5425_v35 = vpop.f32.mrf.mxu1 }
 0x4d3   : > { %5038 = vmatmul.mubr.msk.bf16.vlgmr.msra.gmra.mxu1 %vm1320_vm1, %v2170_v30  ;;  %v5909_v30 = vld [vmem:[%s6217_s20 + $0x8] sm:$0xff] }
 0x4d4   : > { %v2160_v36 = vpop.f32.mrf.mxu1 }
 0x4d5   : > { %v2260_v37 = vpop.f32.mrf.mxu0 }
 0x4d6   : > { %v5426_v31 = vpop.f32.mrf.mxu1 }
 0x4d7   : > { %v2262_v38 = vpop.f32.mrf.mxu0  ;;  %v2852_v31 = vld [vmem:[#allocation6 + $0x1e0] sm:$0xff] }
 0x4d9   : > { %v2264_v39 = vpop.f32.mrf.mxu0 }
 0x4db   : > { %v2265_v40 = vpop.f32.mrf.mxu0 }
 0x546   : > { %v2324_v41 = vpop.f32.mrf.mxu1 }
 0x547   : > { %v2715_v57 = vadd.f32 %v2324_v41, %v2260_v37  ;;  %v2848_v37 = vld [vmem:[#allocation6 + $0x1c0] sm:$0xff]  ;;  %v2853_v41 = vld [vmem:[#allocation6 + $0x1e8] sm:$0xff] }
 0x548   : > { %v2326_v42 = vpop.f32.mrf.mxu1  ;;  %v5095_v39 = vcombine.low %v2848_v37, %v2852_v31  ;;  %v5096_v40 = vcombine.high %v2848_v37, %v2852_v31  ;;  %v2796_v37 = vld [vmem:[#allocation6 + $0x20] sm:$0xff]  ;;  %v2793_v31 = vld [vmem:[#allocation6 + $0x8] sm:$0xff] }
 0x549   : > { %v2722_v55 = vadd.f32 %v2326_v42, %v2262_v38  ;;  %v2849_v38 = vld [vmem:[#allocation6 + $0x1c8] sm:$0xff]  ;;  %v2840_v42 = vld [vmem:[#allocation6 + $0x180] sm:$0xff] }
 0x54a   : > { %v2328_v43 = vpop.f32.mrf.mxu1  ;;  %3602 = vmatprep.subr.bf16.mxu0 %v5096_v40 }
 0x54b   : > { %v2844_v43 = vld [vmem:[#allocation6 + $0x1a0] sm:$0xff]  ;;  %3603 = vmatpush1.bf16.msra.mxu0 %v5095_v39 }
 0x54c   : > { %v2329_v44 = vpop.f32.mrf.mxu1 }
 0x54d   : > { %v5097_v44 = vcombine.low %v2849_v38, %v2853_v41 }
 0x54e   : > { %v2388_v26 = vpop.f32.mrf.mxu0 }
 0x54f   : > { %v2716_v61 = vadd.f32 %v2715_v57, %v2388_v26  ;;  %v5098_v26 = vcombine.high %v2849_v38, %v2853_v41  ;;  %v2797_v38 = vld [vmem:[#allocation6 + $0x28] sm:$0xff] }
 0x550   : > { %v2390_v45 = vpop.f32.mrf.mxu0 }
 0x551   : > { %v2723_v0 = vadd.f32 %v2722_v55, %v2390_v45  ;;  %v5088_v45 = vcombine.high %v2840_v42, %v2844_v43  ;;  %3643 = vmatprep.subr.bf16.mxu1 %v5098_v26  ;;  %v2913_v26 = vld [vmem:[#allocation6 + $0x3c8] sm:$0xff] }
 0x552   : > { %v2392_v46 = vpop.f32.mrf.mxu0  ;;  %3644 = vmatpush1.bf16.msra.mxu1 %v5097_v44  ;;  %v2916_v44 = vld [vmem:[#allocation6 + $0x3e0] sm:$0xff] }
 0x553   : > { %v2841_v46 = vld [vmem:[#allocation6 + $0x188] sm:$0xff]  ;;  %3604 = vmatprep.subr.bf16.mxu0 %v5088_v45 }
 0x554   : > { %v2393_v47 = vpop.f32.mrf.mxu0  ;;  %v2917_v45 = vld [vmem:[#allocation6 + $0x3e8] sm:$0xff] }
 0x555   : > { %v2845_v47 = vld [vmem:[#allocation6 + $0x1a8] sm:$0xff] }
 0x556   : > { %v2452_v48 = vpop.f32.mrf.mxu1  ;;  %v5089_v57 = vcombine.low %v2841_v46, %v2845_v47 }
 0x557   : > { %v2717_v59 = vadd.f32 %v2716_v61, %v2452_v48  ;;  %v2832_v48 = vld [vmem:[#allocation6 + $0x140] sm:$0xff] }
 0x558   : > { %v2454_v49 = vpop.f32.mrf.mxu1  ;;  %v2824_v61 = vld [vmem:[#allocation6 + $0x100] sm:$0xff] }
 0x559   : > { %v2724_v5 = vadd.f32 %v2723_v0, %v2454_v49  ;;  %v5090_v49 = vcombine.high %v2841_v46, %v2845_v47  ;;  %v2825_v0 = vld [vmem:[#allocation6 + $0x108] sm:$0xff]  ;;  %v5041_v47 = vcombine.low %v2793_v31, %v2797_v38 }
 0x55a   : > { %v2456_v50 = vpop.f32.mrf.mxu1 }
 0x55b   : > { %v2836_v50 = vld [vmem:[#allocation6 + $0x160] sm:$0xff]  ;;  %3645 = vmatprep.subr.bf16.mxu1 %v5090_v49  ;;  %v5162_v49 = vcombine.high %v2913_v26, %v2917_v45 }
 0x55c   : > { %v2457_v51 = vpop.f32.mrf.mxu1  ;;  %3646 = vmatpush1.bf16.msra.mxu1 %v5089_v57 }
 0x55d   : > { %v2833_v51 = vld [vmem:[#allocation6 + $0x148] sm:$0xff] }
 0x583   : > { %v2516_v52 = vpop.f32.mrf.mxu0 }
 0x584   : > { %v2718_v10 = vadd.f32 %v2717_v59, %v2516_v52  ;;  %v2837_v52 = vld [vmem:[#allocation6 + $0x168] sm:$0xff] }
 0x585   : > { %v2518_v56 = vpop.f32.mrf.mxu0  ;;  %v5082_v55 = vcombine.high %v2833_v51, %v2837_v52  ;;  %v2829_v59 = vld [vmem:[#allocation6 + $0x128] sm:$0xff] }
 0x586   : > { %v2725_v13 = vadd.f32 %v2724_v5, %v2518_v56  ;;  %v5087_v56 = vcombine.low %v2840_v42, %v2844_v43  ;;  %v5042_v42 = vcombine.high %v2793_v31, %v2797_v38  ;;  %v2912_v43 = vld [vmem:[#allocation6 + $0x3c0] sm:$0xff] }
 0x587   : > { %v2520_v58 = vpop.f32.mrf.mxu0  ;;  %3647 = vmatprep.subr.bf16.mxu1 %v5082_v55  ;;  %v5159_v57 = vcombine.low %v2912_v43, %v2916_v44 }
 0x588   : > { %v5080_v58 = vcombine.high %v2832_v48, %v2836_v50  ;;  %3605 = vmatpush1.bf16.msra.mxu0 %v5087_v56  ;;  %v2909_v56 = vld [vmem:[#allocation6 + $0x3a8] sm:$0xff] }
 0x589   : > { %v2521_v62 = vpop.f32.mrf.mxu0 }
 0x58a   : > { %v2828_v62 = vld [vmem:[#allocation6 + $0x120] sm:$0xff]  ;;  %3606 = vmatprep.subr.bf16.mxu0 %v5080_v58  ;;  %v5161_v58 = vcombine.low %v2913_v26, %v2917_v45 }
 0x58b   : > { %v2644_v1 = vpop.f32.mrf.mxu0  ;;  %v2580_v2 = vpop.f32.mrf.mxu1  ;;  %v5072_v5 = vcombine.high %v2824_v61, %v2828_v62 }
 0x58c   : > { %v2719_v14 = vadd.f32 %v2718_v10, %v2580_v2  ;;  %v5081_v2 = vcombine.low %v2833_v51, %v2837_v52  ;;  %v5074_v10 = vcombine.high %v2825_v0, %v2829_v59  ;;  %v2908_v51 = vld [vmem:[#allocation6 + $0x3a0] sm:$0xff]  ;;  %v2905_v52 = vld [vmem:[#allocation6 + $0x388] sm:$0xff] }
 0x58d   : > { %v2646_v11 = vpop.f32.mrf.mxu0  ;;  %v2582_v12 = vpop.f32.mrf.mxu1 }
 0x58e   : > { %v2726_v54 = vadd.f32 %v2725_v13, %v2582_v12  ;;  %v2720_v20 = vadd.f32 %v2719_v14, %v2644_v1  ;;  %v5079_v1 = vcombine.low %v2832_v48, %v2836_v50  ;;  %v2820_v12 = vld [vmem:[#allocation6 + $0xe0] sm:$0xff]  ;;  %v2817_v13 = vld [vmem:[#allocation6 + $0xc8] sm:$0xff]  ;;  %3648 = vmatpush1.bf16.msra.mxu1 %v5081_v2  ;;  %v5160_v48 = vcombine.high %v2912_v43, %v2916_v44 }
 0x58f   : > { %v2648_v15 = vpop.f32.mrf.mxu0  ;;  %v2584_v16 = vpop.f32.mrf.mxu1  ;;  %v2821_v14 = vld [vmem:[#allocation6 + $0xe8] sm:$0xff]  ;;  %3649 = vmatprep.subr.bf16.mxu1 %v5074_v10  ;;  %v2904_v50 = vld [vmem:[#allocation6 + $0x380] sm:$0xff] }
 0x590   : > { %v2727_v24 = vadd.f32 %v2726_v54, %v2646_v11  ;;  %v2816_v11 = vld [vmem:[#allocation6 + $0xc0] sm:$0xff]  ;;  %3607 = vmatpush1.bf16.msra.mxu0 %v5079_v1  ;;  %v5071_v15 = vcombine.low %v2824_v61, %v2828_v62  ;;  %v5073_v16 = vcombine.low %v2825_v0, %v2829_v59  ;;  %v5066_v54 = vcombine.high %v2817_v13, %v2821_v14  ;;  %v2865_v43 = vld [vmem:[#allocation6 + $0x248] sm:$0xff] }
 0x591   : > { %v2649_v17 = vpop.f32.mrf.mxu0  ;;  %v2585_v18 = vpop.f32.mrf.mxu1  ;;  %3608 = vmatprep.subr.bf16.mxu0 %v5072_v5  ;;  %v5064_v8 = vcombine.high %v2816_v11, %v2820_v12  ;;  %v5152_v55 = vcombine.high %v2904_v50, %v2908_v51  ;;  %v5154_v61 = vcombine.high %v2905_v52, %v2909_v56  ;;  %v5151_v62 = vcombine.low %v2904_v50, %v2908_v51  ;;  %v2869_v44 = vld [vmem:[#allocation6 + $0x268] sm:$0xff] }
 0x592   : > { %v2808_v17 = vld [vmem:[#allocation6 + $0x80] sm:$0xff]  ;;  %3650 = vmatpush1.bf16.msra.mxu1 %v5073_v16  ;;  %v5153_v0 = vcombine.low %v2905_v52, %v2909_v56  ;;  %v2857_v50 = vld [vmem:[#allocation6 + $0x208] sm:$0xff]  ;;  %v5113_v56 = vcombine.low %v2865_v43, %v2869_v44 }
 0x593   : > { %v2708_v21 = vpop.f32.mrf.mxu1  ;;  %v2812_v18 = vld [vmem:[#allocation6 + $0xa0] sm:$0xff]  ;;  %3651 = vmatprep.subr.bf16.mxu1 %v5066_v54  ;;  %v2861_v51 = vld [vmem:[#allocation6 + $0x228] sm:$0xff] }
 0x594   : > { %v2721_v25 = vadd.f32 %v2720_v20, %v2708_v21  ;;  %v2809_v20 = vld [vmem:[#allocation6 + $0x88] sm:$0xff]  ;;  %3609 = vmatpush1.bf16.msra.mxu0 %v5071_v15  ;;  %v5063_v21 = vcombine.low %v2816_v11, %v2820_v12 }
 0x595   : > { %v2710_v63 = vpop.f32.mrf.mxu1  ;;  %3610 = vmatprep.subr.bf16.mxu0 %v5064_v8  ;;  %v2897_v15 = vld [vmem:[#allocation6 + $0x348] sm:$0xff] }
 0x596   : > { %v2741_v28 = vadd.f32 %v2734_v3, %v2721_v25  ;;  %v2728_v27 = vadd.f32 %v2727_v24, %v2710_v63  ;;  %v2813_v3 = vld [vmem:[#allocation6 + $0xa8] sm:$0xff]  ;;  %v5065_v24 = vcombine.low %v2817_v13, %v2821_v14  ;;  %v5056_v25 = vcombine.high %v2808_v17, %v2812_v18  ;;  %v2800_v63 = vld [vmem:[#allocation6 + $0x40] sm:$0xff] }
 0x597   : > { %v2712_v29 = vpop.f32.mrf.mxu1  ;;  %v2896_v13 = vld [vmem:[#allocation6 + $0x340] sm:$0xff]  ;;  %v2901_v8 = vld [vmem:[#allocation6 + $0x368] sm:$0xff] }
 0x598   : > { %v2742_v32 = vadd.f32 %v2738_v19, %v2728_v27  ;;  %v6465_v34 = vadd.f32 %v5908_v33, %v2741_v28  ;;  %v5058_v19 = vcombine.high %v2809_v20, %v2813_v3  ;;  %v2804_v28 = vld [vmem:[#allocation6 + $0x60] sm:$0xff]  ;;  %v2801_v27 = vld [vmem:[#allocation6 + $0x48] sm:$0xff]  ;;  %3611 = vmatpush1.bf16.msra.mxu0 %v5063_v21  ;;  %3652 = vmatpush1.bf16.msra.mxu1 %v5065_v24 }
 0x599   : > { %v2713_v4 = vpop.f32.mrf.mxu1  ;;  %v2805_v29 = vld [vmem:[#allocation6 + $0x68] sm:$0xff]  ;;  %3612 = vmatprep.subr.bf16.mxu0 %v5056_v25  ;;  %v5048_v33 = vcombine.high %v2800_v63, %v2804_v28  ;;  %v5047_v39 = vcombine.low %v2800_v63, %v2804_v28  ;;  %v2900_v14 = vld [vmem:[#allocation6 + $0x360] sm:$0xff] }
 0x59a   : > { %v6468_v35 = vadd.f32 %v5909_v30, %v2742_v32  ;;  %v5055_v32 = vcombine.low %v2808_v17, %v2812_v18  ;;  %v5057_v4 = vcombine.low %v2809_v20, %v2813_v3  ;;  %3653 = vmatprep.subr.bf16.mxu1 %v5058_v19  ;;  %v5050_v30 = vcombine.high %v2801_v27, %v2805_v29  ;;  %v2892_v18 = vld [vmem:[#allocation6 + $0x320] sm:$0xff]  ;;  %v2889_v20 = vld [vmem:[#allocation6 + $0x308] sm:$0xff] }
 0x59b   : > { %v5049_v40 = vcombine.low %v2801_v27, %v2805_v29  ;;  %v5144_v16 = vcombine.high %v2896_v13, %v2900_v14  ;;  %v5143_v54 = vcombine.low %v2896_v13, %v2900_v14  ;;  %v5145_v17 = vcombine.low %v2897_v15, %v2901_v8  ;;  %v2893_v24 = vld [vmem:[#allocation6 + $0x328] sm:$0xff]  ;;  %v2880_v25 = vld [vmem:[#allocation6 + $0x2c0] sm:$0xff] }
 0x59c   : > { %v2745_v36 = vadd.f32 %v6468_v35, %v6465_v34  ;;  %3613 = vmatpush1.bf16.msra.mxu0 %v5055_v32  ;;  %3654 = vmatpush1.bf16.msra.mxu1 %v5057_v4  ;;  %v2884_v19 = vld [vmem:[#allocation6 + $0x2e0] sm:$0xff]  ;;  %v5137_v63 = vcombine.low %v2889_v20, %v2893_v24  ;;  %v5138_v28 = vcombine.high %v2889_v20, %v2893_v24  ;;  %v2881_v29 = vld [vmem:[#allocation6 + $0x2c8] sm:$0xff] }
 0x59d   : > { %3614 = vmatprep.subr.bf16.mxu0 %v5048_v33  ;;  %3655 = vmatprep.subr.bf16.mxu1 %v5050_v30  ;;  %v5128_v27 = vcombine.high %v2880_v25, %v2884_v19  ;;  %v2885_v32 = vld [vmem:[#allocation6 + $0x2e8] sm:$0xff]  ;;  %v2872_v4 = vld [vmem:[#allocation6 + $0x280] sm:$0xff]  ;;  %v5127_v31 = vcombine.low %v2880_v25, %v2884_v19 }
 0x59e   : > { %2746 = vadd.xlane.f32.xlu0 %v2745_v36  ;;  %v2792_v36 = vld [vmem:[#allocation6] sm:$0xff]  ;;  %v5130_v33 = vcombine.high %v2881_v29, %v2885_v32  ;;  %v5129_v38 = vcombine.low %v2881_v29, %v2885_v32  ;;  %v2843_v29 = vld [vmem:[#allocation6 + $0x198] sm:$0xff] }
 0x59f   : > { %v5040_v41 = vcombine.high %v2792_v36, %v2796_v37  ;;  %v5039_v46 = vcombine.low %v2792_v36, %v2796_v37  ;;  %v2876_v30 = vld [vmem:[#allocation6 + $0x2a0] sm:$0xff]  ;;  %v2873_v36 = vld [vmem:[#allocation6 + $0x288] sm:$0xff]  ;;  %v2847_v32 = vld [vmem:[#allocation6 + $0x1b8] sm:$0xff] }
 0x5a0   : > { %3615 = vmatpush1.bf16.msra.mxu0 %v5047_v39  ;;  %3656 = vmatpush1.bf16.msra.mxu1 %v5049_v40  ;;  %v2877_v37 = vld [vmem:[#allocation6 + $0x2a8] sm:$0xff]  ;;  %v5120_v39 = vcombine.high %v2872_v4, %v2876_v30  ;;  %v5119_v26 = vcombine.low %v2872_v4, %v2876_v30  ;;  %v5094_v30 = vcombine.high %v2843_v29, %v2847_v32 }
 0x5a1   : > { %3616 = vmatprep.subr.bf16.mxu0 %v5040_v41  ;;  %3657 = vmatprep.subr.bf16.mxu1 %v5042_v42  ;;  %v5122_v40 = vcombine.high %v2873_v36, %v2877_v37  ;;  %v2864_v41 = vld [vmem:[#allocation6 + $0x240] sm:$0xff]  ;;  %v5121_v45 = vcombine.low %v2873_v36, %v2877_v37  ;;  %v2838_v36 = vld [vmem:[#allocation6 + $0x170] sm:$0xff]  ;;  %v2835_v37 = vld [vmem:[#allocation6 + $0x158] sm:$0xff] }
 0x5a2   : > { %v2868_v42 = vld [vmem:[#allocation6 + $0x260] sm:$0xff] }
 0x5a3   : > { %v5111_v52 = vcombine.low %v2864_v41, %v2868_v42 }
 0x5a4   : > { %3617 = vmatpush1.bf16.msra.mxu0 %v5039_v46  ;;  %3658 = vmatpush1.bf16.msra.mxu1 %v5041_v47  ;;  %v5112_v46 = vcombine.high %v2864_v41, %v2868_v42  ;;  %v5114_v47 = vcombine.high %v2865_v43, %v2869_v44  ;;  %v2826_v42 = vld [vmem:[#allocation6 + $0x110] sm:$0xff]  ;;  %v2827_v44 = vld [vmem:[#allocation6 + $0x118] sm:$0xff] }
 0x5a5   : > { %3618 = vmatprep.subr.bf16.mxu0 %v5160_v48  ;;  %3659 = vmatprep.subr.bf16.mxu1 %v5162_v49  ;;  %v2856_v48 = vld [vmem:[#allocation6 + $0x200] sm:$0xff]  ;;  %v2830_v43 = vld [vmem:[#allocation6 + $0x130] sm:$0xff] }
 0x5a6   : > { %v2860_v49 = vld [vmem:[#allocation6 + $0x220] sm:$0xff] }
 0x5a8   : > { %3619 = vmatpush2.bf16.msra.mxu0 %v5159_v57  ;;  %3660 = vmatpush2.bf16.msra.mxu1 %v5161_v58  ;;  %v5104_v57 = vcombine.high %v2856_v48, %v2860_v49  ;;  %v5106_v58 = vcombine.high %v2857_v50, %v2861_v51 }
 0x5a9   : > { %3620 = vmatprep.subr.bf16.mxu0 %v5152_v55  ;;  %3661 = vmatprep.subr.bf16.mxu1 %v5154_v61  ;;  %v5103_v55 = vcombine.low %v2856_v48, %v2860_v49  ;;  %v5105_v61 = vcombine.low %v2857_v50, %v2861_v51  ;;  %v2818_v49 = vld [vmem:[#allocation6 + $0xd0] sm:$0xff]  ;;  %v2819_v51 = vld [vmem:[#allocation6 + $0xd8] sm:$0xff] }
 0x5aa   : > { %v2822_v50 = vld [vmem:[#allocation6 + $0xf0] sm:$0xff] }
 0x5ac   : > { %3621 = vmatpush2.bf16.msra.mxu0 %v5151_v62  ;;  %3662 = vmatpush2.bf16.msra.mxu1 %v5153_v0  ;;  %v2850_v62 = vld [vmem:[#allocation6 + $0x1d0] sm:$0xff] }
 0x5ad   : > { %3622 = vmatprep.subr.bf16.mxu0 %v5144_v16  ;;  %v2854_v0 = vld [vmem:[#allocation6 + $0x1f0] sm:$0xff] }
 0x5b0   : > { %3623 = vmatpush2.bf16.msra.mxu0 %v5143_v54  ;;  %v2776_v54 = vld [vmem:[%s6564_s6] sm:$0x3] }
 0x5b1   : > { %v2785_v20 = vrot.slane %v2776_v54, %v6248_v23 }
 0x627   : > { %v2747_v59 = vpop.xlane.xlu0 %2746 }
 0x628   : > { %v2749_v1 = vmul.f32 0.00390625, %v2747_v59  ;;  %v2851_v59 = vld [vmem:[#allocation6 + $0x1d8] sm:$0xff] }
 0x62a   : > { %v6473_v2 = vsub.f32 %v6465_v34, %v2749_v1  ;;  %v6476_v5 = vsub.f32 %v6468_v35, %v2749_v1  ;;  %v5146_v34 = vcombine.high %v2897_v15, %v2901_v8  ;;  %v2888_v35 = vld [vmem:[#allocation6 + $0x300] sm:$0xff]  ;;  %v5100_v1 = vcombine.high %v2850_v62, %v2854_v0 }
 0x62b   : > { %v5135_v3 = vcombine.low %v2888_v35, %v2892_v18  ;;  %v5136_v21 = vcombine.high %v2888_v35, %v2892_v18  ;;  %v2762_v8 = vld [vmem:[%s6563_s5] sm:$0x3] }
 0x62c   : > { %v2752_v10 = vmul.f32 %v6473_v2, %v6473_v2  ;;  %v2753_v11 = vmul.f32 %v6476_v5, %v6476_v5  ;;  %3663 = vmatprep.subr.bf16.mxu1 %v5146_v34  ;;  %v2767_v34 = vrot.slane %v2762_v8, %v6237_v9 }
 0x62d   : > { %3664 = vmatpush2.bf16.msra.mxu1 %v5145_v17  ;;  %3624 = vmatprep.subr.bf16.mxu0 %v5136_v21  ;;  %v2771_v17 = vrot.slane %v2762_v8, %v6248_v23  ;;  %v2781_v21 = vrot.slane %v2776_v54, %v6237_v9 }
 0x62e   : > { %v2754_v12 = vadd.f32 %v2753_v11, %v2752_v10  ;;  %3665 = vmatprep.subr.bf16.mxu1 %v5138_v28  ;;  %3625 = vmatpush2.bf16.msra.mxu0 %v5135_v3  ;;  %v2855_v10 = vld [vmem:[#allocation6 + $0x1f8] sm:$0xff]  ;;  %v5099_v11 = vcombine.low %v2850_v62, %v2854_v0  ;;  %v2842_v28 = vld [vmem:[#allocation6 + $0x190] sm:$0xff] }
 0x62f   : > { %3626 = vmatprep.subr.bf16.mxu0 %v5128_v27  ;;  %v5102_v13 = vcombine.high %v2851_v59, %v2855_v10  ;;  %v2846_v27 = vld [vmem:[#allocation6 + $0x1b0] sm:$0xff]  ;;  %v2811_v0 = vld [vmem:[#allocation6 + $0x98] sm:$0xff] }
 0x630   : > { %2755 = vadd.xlane.f32.xlu1 %v2754_v12  ;;  %v5101_v12 = vcombine.low %v2851_v59, %v2855_v10  ;;  %v2814_v62 = vld [vmem:[#allocation6 + $0xb0] sm:$0xff]  ;;  %v2815_v59 = vld [vmem:[#allocation6 + $0xb8] sm:$0xff] }
 0x631   : > { %3666 = vmatpush2.bf16.msra.mxu1 %v5137_v63  ;;  %v5061_v54 = vcombine.low %v2811_v0, %v2815_v59 }
 0x632   : > { %3667 = vmatprep.subr.bf16.mxu1 %v5130_v33  ;;  %3627 = vmatpush2.bf16.msra.mxu0 %v5127_v31  ;;  %v5092_v33 = vcombine.high %v2842_v28, %v2846_v27  ;;  %v2839_v31 = vld [vmem:[#allocation6 + $0x178] sm:$0xff] }
 0x633   : > { %3628 = vmatprep.subr.bf16.mxu0 %v5120_v39  ;;  %v5093_v39 = vcombine.low %v2843_v29, %v2847_v32  ;;  %v5086_v41 = vcombine.high %v2835_v37, %v2839_v31  ;;  %v2918_v29 = vld [vmem:[#allocation6 + $0x3f0] sm:$0xff]  ;;  %v2915_v32 = vld [vmem:[#allocation6 + $0x3d8] sm:$0xff] }
 0x635   : > { %3668 = vmatpush2.bf16.msra.mxu1 %v5129_v38  ;;  %v5091_v38 = vcombine.low %v2842_v28, %v2846_v27  ;;  %v2914_v27 = vld [vmem:[#allocation6 + $0x3d0] sm:$0xff] }
 0x636   : > { %3669 = vmatprep.subr.bf16.mxu1 %v5122_v40  ;;  %3629 = vmatpush2.bf16.msra.mxu0 %v5119_v26  ;;  %v2831_v26 = vld [vmem:[#allocation6 + $0x138] sm:$0xff] }
 0x637   : > { %3630 = vmatprep.subr.bf16.mxu0 %v5112_v46  ;;  %v5085_v46 = vcombine.low %v2835_v37, %v2839_v31  ;;  %v5078_v48 = vcombine.high %v2827_v44, %v2831_v26  ;;  %v2906_v37 = vld [vmem:[#allocation6 + $0x390] sm:$0xff] }
 0x638   : > { %v2910_v31 = vld [vmem:[#allocation6 + $0x3b0] sm:$0xff] }
 0x639   : > { %3670 = vmatpush2.bf16.msra.mxu1 %v5121_v45 }
 0x63a   : > { %3671 = vmatprep.subr.bf16.mxu1 %v5114_v47  ;;  %3631 = vmatpush2.bf16.msra.mxu0 %v5111_v52  ;;  %v5076_v47 = vcombine.high %v2826_v42, %v2830_v43  ;;  %v2823_v52 = vld [vmem:[#allocation6 + $0xf8] sm:$0xff] }
 0x63b   : > { %3632 = vmatprep.subr.bf16.mxu0 %v5104_v57  ;;  %v5077_v57 = vcombine.low %v2827_v44, %v2831_v26  ;;  %v5069_v10 = vcombine.low %v2819_v51, %v2823_v52  ;;  %v2898_v44 = vld [vmem:[#allocation6 + $0x350] sm:$0xff] }
 0x63c   : > { %v2902_v26 = vld [vmem:[#allocation6 + $0x370] sm:$0xff] }
 0x63d   : > { %3672 = vmatpush2.bf16.msra.mxu1 %v5113_v56  ;;  %v5075_v56 = vcombine.low %v2826_v42, %v2830_v43  ;;  %v5156_v42 = vcombine.high %v2906_v37, %v2910_v31 }
 0x63e   : > { %3673 = vmatprep.subr.bf16.mxu1 %v5106_v58  ;;  %3633 = vmatpush2.bf16.msra.mxu0 %v5103_v55  ;;  %v5068_v58 = vcombine.high %v2818_v49, %v2822_v50  ;;  %v5070_v55 = vcombine.high %v2819_v51, %v2823_v52  ;;  %v2890_v51 = vld [vmem:[#allocation6 + $0x310] sm:$0xff] }
 0x63f   : > { %3684 = vmatprep.subr.bf16.mxu0 %v5100_v1  ;;  %v5067_v1 = vcombine.low %v2818_v49, %v2822_v50  ;;  %v5148_v49 = vcombine.high %v2898_v44, %v2902_v26  ;;  %v2894_v52 = vld [vmem:[#allocation6 + $0x330] sm:$0xff] }
 0x641   : > { %3674 = vmatpush2.bf16.msra.mxu1 %v5105_v61  ;;  %v2810_v61 = vld [vmem:[#allocation6 + $0x90] sm:$0xff] }
 0x642   : > { %3725 = vmatprep.subr.bf16.mxu1 %v5102_v13  ;;  %v2802_v13 = vld [vmem:[#allocation6 + $0x50] sm:$0xff]  ;;  %v5059_v8 = vcombine.low %v2810_v61, %v2814_v62 }
 0x6b9   : > { %v2756_v14 = vpop.xlane.xlu1 %2755 }
 0x6ba   : > { %v2757_v15 = vmul.f32 0.00390625, %v2756_v14  ;;  %v2806_v14 = vld [vmem:[#allocation6 + $0x70] sm:$0xff] }
 0x6bc   : > { %v2758_v16 = vadd.f32 1e-05, %v2757_v15  ;;  %v2803_v15 = vld [vmem:[#allocation6 + $0x58] sm:$0xff] }
 0x6be   : > { %5904 = vrsqrt.f32 %v2758_v16  ;;  %v2807_v16 = vld [vmem:[#allocation6 + $0x78] sm:$0xff] }
 0x6cb   : > { %v5905_v35 = vpop.eup %5904 }
 0x6cc   : > { %v2761_v18 = vmul.f32 %v5905_v35, %v6476_v5  ;;  %v2760_v3 = vmul.f32 %v5905_v35, %v6473_v2  ;;  %v2834_v2 = vld [vmem:[#allocation6 + $0x150] sm:$0xff] }
 0x6cd   : > { %v5084_v40 = vcombine.high %v2834_v2, %v2838_v36  ;;  %v5083_v45 = vcombine.low %v2834_v2, %v2838_v36  ;;  %v2794_v35 = vld [vmem:[#allocation6 + $0x10] sm:$0xff] }
 0x6ce   : > { %v2775_v24 = vmul.f32 %v2771_v17, %v2761_v18  ;;  %v2774_v25 = vmul.f32 %v2767_v34, %v2760_v3  ;;  %v5052_v17 = vcombine.high %v2802_v13, %v2806_v14  ;;  %v5054_v34 = vcombine.high %v2803_v15, %v2807_v16  ;;  %v2798_v18 = vld [vmem:[#allocation6 + $0x30] sm:$0xff]  ;;  %v2799_v3 = vld [vmem:[#allocation6 + $0x38] sm:$0xff] }
 0x6cf   : > { %v5043_v2 = vcombine.low %v2794_v35, %v2798_v18 }
 0x6d0   : > { %v6494_v19 = vadd.f32 %v2785_v20, %v2775_v24  ;;  %v6496_v63 = vadd.f32 %v2781_v21, %v2774_v25  ;;  %v2795_v20 = vld [vmem:[#allocation6 + $0x18] sm:$0xff]  ;;  %v5051_v21 = vcombine.low %v2802_v13, %v2806_v14  ;;  %v5053_v24 = vcombine.low %v2803_v15, %v2807_v16  ;;  %v2874_v15 = vld [vmem:[#allocation6 + $0x290] sm:$0xff] }
 0x6d1   : > { %v5044_v25 = vcombine.high %v2794_v35, %v2798_v18  ;;  %v5046_v28 = vcombine.high %v2795_v20, %v2799_v3  ;;  %v2878_v16 = vld [vmem:[#allocation6 + $0x2b0] sm:$0xff] }
 0x6d2   : > { %v2791_v4 = vpack.c.bf16 %v6494_v19, %v6494_v19  ;;  %v6502_v5 = vpack.c.bf16 %v6496_v63, %v6496_v63  ;;  %v5124_v35 = vcombine.high %v2874_v15, %v2878_v16 }
 0x6d4   : > { %3634 = vmatprep.mubr.bf16.mxu0 %v2791_v4  ;;  %3675 = vmatprep.mubr.bf16.mxu1 %v2791_v4 }
 0x6d5   : > { %3635 = vmatmul.mubr.bf16.vlgmr.msra.gmra.mxu0 %v6502_v5  ;;  %3676 = vmatmul.mubr.bf16.vlgmr.msra.gmra.mxu1 %v6502_v5 }
 0x6d6   : > { %3685 = vmatpush1.bf16.msra.mxu0 %v5099_v11  ;;  %3726 = vmatpush1.bf16.msra.mxu1 %v5101_v12  ;;  %v5060_v11 = vcombine.high %v2810_v61, %v2814_v62  ;;  %v5062_v12 = vcombine.high %v2811_v0, %v2815_v59  ;;  %v5140_v61 = vcombine.high %v2890_v51, %v2894_v52  ;;  %v2882_v0 = vld [vmem:[#allocation6 + $0x2d0] sm:$0xff] }
 0x6d7   : > { %3716 = vmatprep.mubr.bf16.mxu0 %v2791_v4  ;;  %3757 = vmatprep.mubr.bf16.mxu1 %v2791_v4  ;;  %v2919_v4 = vld [vmem:[#allocation6 + $0x3f8] sm:$0xff]  ;;  %v2886_v59 = vld [vmem:[#allocation6 + $0x2f0] sm:$0xff] }
 0x6d8   : > { %3686 = vmatprep.subr.bf16.mxu0 %v5092_v33  ;;  %3727 = vmatprep.subr.bf16.mxu1 %v5094_v30  ;;  %v5045_v33 = vcombine.low %v2795_v20, %v2799_v3  ;;  %v5164_v30 = vcombine.high %v2914_v27, %v2918_v29  ;;  %v5166_v36 = vcombine.high %v2915_v32, %v2919_v4  ;;  %v2866_v20 = vld [vmem:[#allocation6 + $0x250] sm:$0xff] }
 0x6d9   : > { %v5132_v13 = vcombine.high %v2882_v0, %v2886_v59  ;;  %v2870_v3 = vld [vmem:[#allocation6 + $0x270] sm:$0xff] }
 0x6da   : > { %3687 = vmatpush1.bf16.msra.mxu0 %v5091_v38  ;;  %3728 = vmatpush1.bf16.msra.mxu1 %v5093_v39  ;;  %v2907_v38 = vld [vmem:[#allocation6 + $0x398] sm:$0xff] }
 0x6db   : > { %3688 = vmatprep.subr.bf16.mxu0 %v5084_v40  ;;  %3729 = vmatprep.subr.bf16.mxu1 %v5086_v41  ;;  %v2911_v39 = vld [vmem:[#allocation6 + $0x3b8] sm:$0xff]  ;;  %v5163_v40 = vcombine.low %v2914_v27, %v2918_v29  ;;  %v5165_v41 = vcombine.low %v2915_v32, %v2919_v4  ;;  %v5116_v27 = vcombine.high %v2866_v20, %v2870_v3  ;;  %v2858_v32 = vld [vmem:[#allocation6 + $0x210] sm:$0xff] }
 0x6dc   : > { %v5158_v43 = vcombine.high %v2907_v38, %v2911_v39  ;;  %v2862_v4 = vld [vmem:[#allocation6 + $0x230] sm:$0xff] }
 0x6de   : > { %3689 = vmatpush1.bf16.msra.mxu0 %v5083_v45  ;;  %3730 = vmatpush1.bf16.msra.mxu1 %v5085_v46  ;;  %v2899_v45 = vld [vmem:[#allocation6 + $0x358] sm:$0xff] }
 0x6df   : > { %3690 = vmatprep.subr.bf16.mxu0 %v5076_v47  ;;  %3731 = vmatprep.subr.bf16.mxu1 %v5078_v48  ;;  %v2903_v46 = vld [vmem:[#allocation6 + $0x378] sm:$0xff]  ;;  %v5155_v47 = vcombine.low %v2906_v37, %v2910_v31  ;;  %v5157_v48 = vcombine.low %v2907_v38, %v2911_v39  ;;  %v5108_v37 = vcombine.high %v2858_v32, %v2862_v4 }
 0x6e0   : > { %v5150_v50 = vcombine.high %v2899_v45, %v2903_v46  ;;  %v5107_v38 = vcombine.low %v2858_v32, %v2862_v4  ;;  %v5751_v32 = vld [vmem:[#allocation7 + $0x1c4] ss:$8 sps:$4 sm:$0xff]   ;;  %v5746_v4 = vld [vmem:[#allocation7 + $0xc0] ss:$8 sps:$4 sm:$0xff]  }
 0x6e2   : > { %3691 = vmatpush1.bf16.msra.mxu0 %v5075_v56  ;;  %3732 = vmatpush1.bf16.msra.mxu1 %v5077_v57  ;;  %v2891_v56 = vld [vmem:[#allocation6 + $0x318] sm:$0xff] }
 0x6e3   : > { %3692 = vmatprep.subr.bf16.mxu0 %v5068_v58  ;;  %3733 = vmatprep.subr.bf16.mxu1 %v5070_v55  ;;  %v2895_v57 = vld [vmem:[#allocation6 + $0x338] sm:$0xff]  ;;  %v5147_v58 = vcombine.low %v2898_v44, %v2902_v26  ;;  %v5149_v55 = vcombine.low %v2899_v45, %v2903_v46  ;;  %v5688_v44 = vld [vmem:[#allocation7 + $0x64] ss:$8 sps:$4 sm:$0xff]   ;;  %v5686_v45 = vld [vmem:[#allocation7 + $0x60] ss:$8 sps:$4 sm:$0xff]  }
 0x6e4   : > { %v5142_v62 = vcombine.high %v2891_v56, %v2895_v57  ;;  %v5691_v26 = vld [vmem:[#allocation7 + $0x164] ss:$8 sps:$4 sm:$0xff]   ;;  %v5689_v46 = vld [vmem:[#allocation7 + $0x160] ss:$8 sps:$4 sm:$0xff]  }
 0x6e6   : > { %3693 = vmatpush1.bf16.msra.mxu0 %v5067_v1  ;;  %3734 = vmatpush1.bf16.msra.mxu1 %v5069_v10  ;;  %v2883_v1 = vld [vmem:[#allocation6 + $0x2d8] sm:$0xff] }
 0x6e7   : > { %3694 = vmatprep.subr.bf16.mxu0 %v5060_v11  ;;  %3735 = vmatprep.subr.bf16.mxu1 %v5062_v12  ;;  %v2887_v10 = vld [vmem:[#allocation6 + $0x2f8] sm:$0xff]  ;;  %v5139_v11 = vcombine.low %v2890_v51, %v2894_v52  ;;  %v5141_v12 = vcombine.low %v2891_v56, %v2895_v57  ;;  %v5700_v51 = vld [vmem:[#allocation7 + $0x44] ss:$8 sps:$4 sm:$0xff]   ;;  %v5698_v56 = vld [vmem:[#allocation7 + $0x40] ss:$8 sps:$4 sm:$0xff]  }
 0x6e8   : > { %v5134_v14 = vcombine.high %v2883_v1, %v2887_v10  ;;  %v5703_v52 = vld [vmem:[#allocation7 + $0x144] ss:$8 sps:$4 sm:$0xff]   ;;  %v5706_v57 = vld [vmem:[#allocation7 + $0x34] ss:$8 sps:$4 sm:$0xff]  }
 0x6ea   : > { %3695 = vmatpush1.bf16.msra.mxu0 %v5059_v8  ;;  %3736 = vmatpush1.bf16.msra.mxu1 %v5061_v54  ;;  %v2875_v8 = vld [vmem:[#allocation6 + $0x298] sm:$0xff] }
 0x6eb   : > { %3696 = vmatprep.subr.bf16.mxu0 %v5052_v17  ;;  %3737 = vmatprep.subr.bf16.mxu1 %v5054_v34  ;;  %v2879_v54 = vld [vmem:[#allocation6 + $0x2b8] sm:$0xff]  ;;  %v5131_v17 = vcombine.low %v2882_v0, %v2886_v59  ;;  %v5133_v34 = vcombine.low %v2883_v1, %v2887_v10  ;;  %v5715_v0 = vld [vmem:[#allocation7 + $0x124] ss:$8 sps:$4 sm:$0xff]   ;;  %v5710_v59 = vld [vmem:[#allocation7 + $0x20] ss:$8 sps:$4 sm:$0xff]  }
 0x6ec   : > { %v5126_v18 = vcombine.high %v2875_v8, %v2879_v54  ;;  %v5713_v1 = vld [vmem:[#allocation7 + $0x120] ss:$8 sps:$4 sm:$0xff]   ;;  %v5718_v10 = vld [vmem:[#allocation7 + $0x14] ss:$8 sps:$4 sm:$0xff]  }
 0x6ee   : > { %3697 = vmatpush1.bf16.msra.mxu0 %v5051_v21  ;;  %3738 = vmatpush1.bf16.msra.mxu1 %v5053_v24  ;;  %v2867_v21 = vld [vmem:[#allocation6 + $0x258] sm:$0xff] }
 0x6ef   : > { %3698 = vmatprep.subr.bf16.mxu0 %v5044_v25  ;;  %3739 = vmatprep.subr.bf16.mxu1 %v5046_v28  ;;  %v2871_v24 = vld [vmem:[#allocation6 + $0x278] sm:$0xff]  ;;  %v5123_v25 = vcombine.low %v2874_v15, %v2878_v16  ;;  %v5125_v28 = vcombine.low %v2875_v8, %v2879_v54  ;;  %v5727_v15 = vld [vmem:[#allocation7 + $0x104] ss:$8 sps:$4 sm:$0xff]   ;;  %v5722_v16 = vld [vmem:[#allocation7] ss:$8 sps:$4 sm:$0xff]  }
 0x6f0   : > { %v5118_v29 = vcombine.high %v2867_v21, %v2871_v24  ;;  %v5725_v8 = vld [vmem:[#allocation7 + $0x100] ss:$8 sps:$4 sm:$0xff]   ;;  %v5730_v54 = vld [vmem:[#allocation7 + $0xf4] ss:$8 sps:$4 sm:$0xff]  }
 0x6f2   : > { %3699 = vmatpush1.bf16.msra.mxu0 %v5043_v2  ;;  %3740 = vmatpush1.bf16.msra.mxu1 %v5045_v33  ;;  %v2859_v2 = vld [vmem:[#allocation6 + $0x218] sm:$0xff] }
 0x6f3   : > { %3700 = vmatprep.subr.bf16.mxu0 %v5164_v30  ;;  %3741 = vmatprep.subr.bf16.mxu1 %v5166_v36  ;;  %v2863_v33 = vld [vmem:[#allocation6 + $0x238] sm:$0xff]  ;;  %v5115_v30 = vcombine.low %v2866_v20, %v2870_v3  ;;  %v5117_v36 = vcombine.low %v2867_v21, %v2871_v24  ;;  %v5739_v20 = vld [vmem:[#allocation7 + $0x1e4] ss:$8 sps:$4 sm:$0xff]   ;;  %v5734_v3 = vld [vmem:[#allocation7 + $0xe0] ss:$8 sps:$4 sm:$0xff]  }
 0x6f4   : > { %v5110_v31 = vcombine.high %v2859_v2, %v2863_v33  ;;  %v5109_v39 = vcombine.low %v2859_v2, %v2863_v33  ;;  %v5737_v21 = vld [vmem:[#allocation7 + $0x1e0] ss:$8 sps:$4 sm:$0xff]   ;;  %v5742_v24 = vld [vmem:[#allocation7 + $0xd4] ss:$8 sps:$4 sm:$0xff]  }
 0x6f5   : > { %v5749_v2 = vld [vmem:[#allocation7 + $0x1c0] ss:$8 sps:$4 sm:$0xff]   ;;  %v5754_v33 = vld [vmem:[#allocation7 + $0xb4] ss:$8 sps:$4 sm:$0xff]  }
 0x6f6   : > { %3701 = vmatpush2.bf16.msra.mxu0 %v5163_v40  ;;  %3742 = vmatpush2.bf16.msra.mxu1 %v5165_v41  ;;  %v5682_v40 = vld [vmem:[#allocation7 + $0x74] ss:$8 sps:$4 sm:$0xff]  }
 0x6f7   : > { %3702 = vmatprep.subr.bf16.mxu0 %v5156_v42  ;;  %3743 = vmatprep.subr.bf16.mxu1 %v5158_v43  ;;  %v5685_v41 = vld [vmem:[#allocation7 + $0x174] ss:$8 sps:$4 sm:$0xff]   ;;  %v5680_v42 = vld [vmem:[#allocation7 + $0x70] ss:$8 sps:$4 sm:$0xff]  }
 0x6f8   : > { %v5683_v43 = vld [vmem:[#allocation7 + $0x170] ss:$8 sps:$4 sm:$0xff]  }
 0x6fa   : > { %3703 = vmatpush2.bf16.msra.mxu0 %v5155_v47  ;;  %3744 = vmatpush2.bf16.msra.mxu1 %v5157_v48  ;;  %v5694_v47 = vld [vmem:[#allocation7 + $0x54] ss:$8 sps:$4 sm:$0xff]  }
 0x6fb   : > { %3704 = vmatprep.subr.bf16.mxu0 %v5148_v49  ;;  %3745 = vmatprep.subr.bf16.mxu1 %v5150_v50  ;;  %v5697_v48 = vld [vmem:[#allocation7 + $0x154] ss:$8 sps:$4 sm:$0xff]   ;;  %v5692_v49 = vld [vmem:[#allocation7 + $0x50] ss:$8 sps:$4 sm:$0xff]  }
 0x6fc   : > { %v5695_v50 = vld [vmem:[#allocation7 + $0x150] ss:$8 sps:$4 sm:$0xff]  }
 0x6fe   : > { %3705 = vmatpush2.bf16.msra.mxu0 %v5147_v58  ;;  %3746 = vmatpush2.bf16.msra.mxu1 %v5149_v55  ;;  %v5709_v58 = vld [vmem:[#allocation7 + $0x134] ss:$8 sps:$4 sm:$0xff]   ;;  %v5704_v55 = vld [vmem:[#allocation7 + $0x30] ss:$8 sps:$4 sm:$0xff]  }
 0x6ff   : > { %3706 = vmatprep.subr.bf16.mxu0 %v5140_v61  ;;  %3747 = vmatprep.subr.bf16.mxu1 %v5142_v62  ;;  %v5707_v61 = vld [vmem:[#allocation7 + $0x130] ss:$8 sps:$4 sm:$0xff]   ;;  %v5712_v62 = vld [vmem:[#allocation7 + $0x24] ss:$8 sps:$4 sm:$0xff]  }
 0x702   : > { %3707 = vmatpush2.bf16.msra.mxu0 %v5139_v11  ;;  %3748 = vmatpush2.bf16.msra.mxu1 %v5141_v12  ;;  %v5721_v11 = vld [vmem:[#allocation7 + $0x114] ss:$8 sps:$4 sm:$0xff]   ;;  %v5716_v12 = vld [vmem:[#allocation7 + $0x10] ss:$8 sps:$4 sm:$0xff]  }
 0x703   : > { %3708 = vmatprep.subr.bf16.mxu0 %v5132_v13  ;;  %3749 = vmatprep.subr.bf16.mxu1 %v5134_v14  ;;  %v5719_v13 = vld [vmem:[#allocation7 + $0x110] ss:$8 sps:$4 sm:$0xff]   ;;  %v5724_v14 = vld [vmem:[#allocation7 + $0x4] ss:$8 sps:$4 sm:$0xff]  }
 0x706   : > { %3709 = vmatpush2.bf16.msra.mxu0 %v5131_v17  ;;  %3750 = vmatpush2.bf16.msra.mxu1 %v5133_v34  ;;  %v5733_v17 = vld [vmem:[#allocation7 + $0x1f4] ss:$8 sps:$4 sm:$0xff]   ;;  %v5728_v34 = vld [vmem:[#allocation7 + $0xf0] ss:$8 sps:$4 sm:$0xff]  }
 0x707   : > { %3710 = vmatprep.subr.bf16.mxu0 %v5124_v35  ;;  %3751 = vmatprep.subr.bf16.mxu1 %v5126_v18  ;;  %v5731_v35 = vld [vmem:[#allocation7 + $0x1f0] ss:$8 sps:$4 sm:$0xff]   ;;  %v5736_v18 = vld [vmem:[#allocation7 + $0xe4] ss:$8 sps:$4 sm:$0xff]  }
 0x70a   : > { %3711 = vmatpush2.bf16.msra.mxu0 %v5123_v25  ;;  %3752 = vmatpush2.bf16.msra.mxu1 %v5125_v28  ;;  %v5745_v25 = vld [vmem:[#allocation7 + $0x1d4] ss:$8 sps:$4 sm:$0xff]   ;;  %v5740_v28 = vld [vmem:[#allocation7 + $0xd0] ss:$8 sps:$4 sm:$0xff]  }
 0x70b   : > { %3712 = vmatprep.subr.bf16.mxu0 %v5116_v27  ;;  %3753 = vmatprep.subr.bf16.mxu1 %v5118_v29  ;;  %v5743_v27 = vld [vmem:[#allocation7 + $0x1d0] ss:$8 sps:$4 sm:$0xff]   ;;  %v5748_v29 = vld [vmem:[#allocation7 + $0xc4] ss:$8 sps:$4 sm:$0xff]  }
 0x70e   : > { %3713 = vmatpush2.bf16.msra.mxu0 %v5115_v30  ;;  %3754 = vmatpush2.bf16.msra.mxu1 %v5117_v36  ;;  %v5757_v30 = vld [vmem:[#allocation7 + $0x1b4] ss:$8 sps:$4 sm:$0xff]   ;;  %v5752_v36 = vld [vmem:[#allocation7 + $0xb0] ss:$8 sps:$4 sm:$0xff]  }
 0x70f   : > { %3714 = vmatprep.subr.bf16.mxu0 %v5108_v37  ;;  %3755 = vmatprep.subr.bf16.mxu1 %v5110_v31  ;;  %v5755_v37 = vld [vmem:[#allocation7 + $0x1b0] ss:$8 sps:$4 sm:$0xff]   ;;  %v5760_v31 = vld [vmem:[#allocation7 + $0xa4] ss:$8 sps:$4 sm:$0xff]  }
 0x712   : > { %3715 = vmatpush2.bf16.msra.mxu0 %v5107_v38  ;;  %3756 = vmatpush2.bf16.msra.mxu1 %v5109_v39  ;;  %v5763_v38 = vld [vmem:[#allocation7 + $0x1a4] ss:$8 sps:$4 sm:$0xff]   ;;  %v5758_v39 = vld [vmem:[#allocation7 + $0xa0] ss:$8 sps:$4 sm:$0xff]  }
 0x713   : > { %4562 = vmatprep.subr.bf16.mxu0 %v5682_v40  ;;  %4603 = vmatprep.subr.bf16.mxu1 %v5685_v41  ;;  %v5761_v40 = vld [vmem:[#allocation7 + $0x1a0] ss:$8 sps:$4 sm:$0xff]   ;;  %v5766_v41 = vld [vmem:[#allocation7 + $0x94] ss:$8 sps:$4 sm:$0xff]  }
 0x715   : > { %3717 = vmatmul.mubr.bf16.vlgmr.msra.gmra.mxu0 %v6502_v5  ;;  %3758 = vmatmul.mubr.bf16.vlgmr.msra.gmra.mxu1 %v6502_v5  ;;  %v5701_v5 = vld [vmem:[#allocation7 + $0x140] ss:$8 sps:$4 sm:$0xff]  }
 0x716   : > { %4563 = vmatpush1.bf16.msra.mxu0 %v5680_v42  ;;  %4604 = vmatpush1.bf16.msra.mxu1 %v5683_v43  ;;  %v5769_v42 = vld [vmem:[#allocation7 + $0x194] ss:$8 sps:$4 sm:$0xff]   ;;  %v5764_v43 = vld [vmem:[#allocation7 + $0x90] ss:$8 sps:$4 sm:$0xff]  }
 0x717   : > { %4564 = vmatprep.subr.bf16.mxu0 %v5688_v44  ;;  %4605 = vmatprep.subr.bf16.mxu1 %v5691_v26  ;;  %v5767_v44 = vld [vmem:[#allocation7 + $0x190] ss:$8 sps:$4 sm:$0xff]   ;;  %v5772_v26 = vld [vmem:[#allocation7 + $0x84] ss:$8 sps:$4 sm:$0xff]  }
 0x71a   : > { %4565 = vmatpush1.bf16.msra.mxu0 %v5686_v45  ;;  %4606 = vmatpush1.bf16.msra.mxu1 %v5689_v46  ;;  %v5775_v45 = vld [vmem:[#allocation7 + $0x184] ss:$8 sps:$4 sm:$0xff]   ;;  %v5770_v46 = vld [vmem:[#allocation7 + $0x80] ss:$8 sps:$4 sm:$0xff]  }
 0x71b   : > { %4566 = vmatprep.subr.bf16.mxu0 %v5694_v47  ;;  %4607 = vmatprep.subr.bf16.mxu1 %v5697_v48  ;;  %v5773_v47 = vld [vmem:[#allocation7 + $0x180] ss:$8 sps:$4 sm:$0xff]   ;;  %v5778_v48 = vld [vmem:[#allocation7 + $0x274] ss:$8 sps:$4 sm:$0xff]  }
 0x71e   : > { %4567 = vmatpush1.bf16.msra.mxu0 %v5692_v49  ;;  %4608 = vmatpush1.bf16.msra.mxu1 %v5695_v50  ;;  %v5781_v49 = vld [vmem:[#allocation7 + $0x374] ss:$8 sps:$4 sm:$0xff]   ;;  %v6511_v50 = vld [vmem:[%s6566_s8] sm:$0xff] }
 0x71f   : > { %4568 = vmatprep.subr.bf16.mxu0 %v5700_v51  ;;  %4609 = vmatprep.subr.bf16.mxu1 %v5703_v52  ;;  %v2925_v51 = vrot.slane %v6511_v50, %v6237_v9  ;;  %v2933_v52 = vrot.slane %v6511_v50, %v613_v7 }
 0x722   : > { %4569 = vmatpush1.bf16.msra.mxu0 %v5698_v56  ;;  %4610 = vmatpush1.bf16.msra.mxu1 %v5701_v5  ;;  %v2929_v56 = vrot.slane %v6511_v50, %v6248_v23  ;;  %v2937_v5 = vrot.slane %v6511_v50, %v617_v22  ;;  %v5779_v22 = vld [vmem:[#allocation7 + $0x370] ss:$8 sps:$4 sm:$0xff]  }
 0x723   : > { %4570 = vmatprep.subr.bf16.mxu0 %v5706_v57  ;;  %4611 = vmatprep.subr.bf16.mxu1 %v5709_v58 }
 0x726   : > { %4571 = vmatpush1.bf16.msra.mxu0 %v5704_v55  ;;  %4612 = vmatpush1.bf16.msra.mxu1 %v5707_v61 }
 0x727   : > { %4572 = vmatprep.subr.bf16.mxu0 %v5712_v62  ;;  %4613 = vmatprep.subr.bf16.mxu1 %v5715_v0 }
 0x72a   : > { %4573 = vmatpush1.bf16.msra.mxu0 %v5710_v59  ;;  %4614 = vmatpush1.bf16.msra.mxu1 %v5713_v1 }
 0x72b   : > { %4574 = vmatprep.subr.bf16.mxu0 %v5718_v10  ;;  %4615 = vmatprep.subr.bf16.mxu1 %v5721_v11 }
 0x72e   : > { %4575 = vmatpush1.bf16.msra.mxu0 %v5716_v12  ;;  %4616 = vmatpush1.bf16.msra.mxu1 %v5719_v13 }
 0x72f   : > { %4576 = vmatprep.subr.bf16.mxu0 %v5724_v14  ;;  %4617 = vmatprep.subr.bf16.mxu1 %v5727_v15 }
 0x732   : > { %4577 = vmatpush1.bf16.msra.mxu0 %v5722_v16  ;;  %4618 = vmatpush1.bf16.msra.mxu1 %v5725_v8 }
 0x733   : > { %4578 = vmatprep.subr.bf16.mxu0 %v5730_v54  ;;  %4619 = vmatprep.subr.bf16.mxu1 %v5733_v17  ;;  %v5776_v17 = vld [vmem:[#allocation7 + $0x270] ss:$8 sps:$4 sm:$0xff]  }
 0x736   : > { %4579 = vmatpush2.bf16.msra.mxu0 %v5728_v34  ;;  %4620 = vmatpush2.bf16.msra.mxu1 %v5731_v35 }
 0x737   : > { %4580 = vmatprep.subr.bf16.mxu0 %v5736_v18  ;;  %4621 = vmatprep.subr.bf16.mxu1 %v5739_v20  ;;  %v5784_v18 = vld [vmem:[#allocation7 + $0x264] ss:$8 sps:$4 sm:$0xff]  }
 0x738   : > { %v5787_v20 = vld [vmem:[#allocation7 + $0x364] ss:$8 sps:$4 sm:$0xff]  }
 0x73a   : > { %4581 = vmatpush2.bf16.msra.mxu0 %v5734_v3  ;;  %4622 = vmatpush2.bf16.msra.mxu1 %v5737_v21  ;;  %v5782_v3 = vld [vmem:[#allocation7 + $0x260] ss:$8 sps:$4 sm:$0xff]  }
 0x73b   : > { %4582 = vmatprep.subr.bf16.mxu0 %v5742_v24  ;;  %4623 = vmatprep.subr.bf16.mxu1 %v5745_v25  ;;  %v5785_v21 = vld [vmem:[#allocation7 + $0x360] ss:$8 sps:$4 sm:$0xff]   ;;  %v5790_v24 = vld [vmem:[#allocation7 + $0x254] ss:$8 sps:$4 sm:$0xff]  }
 0x73c   : > { %v5793_v25 = vld [vmem:[#allocation7 + $0x354] ss:$8 sps:$4 sm:$0xff]  }
 0x73e   : > { %4583 = vmatpush2.bf16.msra.mxu0 %v5740_v28  ;;  %4624 = vmatpush2.bf16.msra.mxu1 %v5743_v27  ;;  %v5788_v28 = vld [vmem:[#allocation7 + $0x250] ss:$8 sps:$4 sm:$0xff]  }
 0x73f   : > { %4584 = vmatprep.subr.bf16.mxu0 %v5748_v29  ;;  %4625 = vmatprep.subr.bf16.mxu1 %v5751_v32  ;;  %v5791_v27 = vld [vmem:[#allocation7 + $0x350] ss:$8 sps:$4 sm:$0xff]   ;;  %v5796_v29 = vld [vmem:[#allocation7 + $0x244] ss:$8 sps:$4 sm:$0xff]  }
 0x740   : > { %v5799_v32 = vld [vmem:[#allocation7 + $0x344] ss:$8 sps:$4 sm:$0xff]  }
 0x742   : > { %4585 = vmatpush2.bf16.msra.mxu0 %v5746_v4  ;;  %4626 = vmatpush2.bf16.msra.mxu1 %v5749_v2  ;;  %v5794_v4 = vld [vmem:[#allocation7 + $0x240] ss:$8 sps:$4 sm:$0xff]  }
 0x743   : > { %4586 = vmatprep.subr.bf16.mxu0 %v5754_v33  ;;  %4627 = vmatprep.subr.bf16.mxu1 %v5757_v30  ;;  %v5797_v2 = vld [vmem:[#allocation7 + $0x340] ss:$8 sps:$4 sm:$0xff]   ;;  %v5802_v33 = vld [vmem:[#allocation7 + $0x234] ss:$8 sps:$4 sm:$0xff]  }
 0x744   : > { %v5805_v30 = vld [vmem:[#allocation7 + $0x334] ss:$8 sps:$4 sm:$0xff]  }
 0x746   : > { %4587 = vmatpush2.bf16.msra.mxu0 %v5752_v36  ;;  %4628 = vmatpush2.bf16.msra.mxu1 %v5755_v37  ;;  %v5800_v36 = vld [vmem:[#allocation7 + $0x230] ss:$8 sps:$4 sm:$0xff]  }
 0x747   : > { %4588 = vmatprep.subr.bf16.mxu0 %v5760_v31  ;;  %4629 = vmatprep.subr.bf16.mxu1 %v5763_v38  ;;  %v5803_v37 = vld [vmem:[#allocation7 + $0x330] ss:$8 sps:$4 sm:$0xff]   ;;  %v5808_v31 = vld [vmem:[#allocation7 + $0x224] ss:$8 sps:$4 sm:$0xff]  }
 0x748   : > { %v5811_v38 = vld [vmem:[#allocation7 + $0x324] ss:$8 sps:$4 sm:$0xff]  }
 0x74a   : > { %4589 = vmatpush2.bf16.msra.mxu0 %v5758_v39  ;;  %4630 = vmatpush2.bf16.msra.mxu1 %v5761_v40  ;;  %v5806_v39 = vld [vmem:[#allocation7 + $0x220] ss:$8 sps:$4 sm:$0xff]  }
 0x74b   : > { %4590 = vmatprep.subr.bf16.mxu0 %v5766_v41  ;;  %4631 = vmatprep.subr.bf16.mxu1 %v5769_v42  ;;  %v5809_v40 = vld [vmem:[#allocation7 + $0x320] ss:$8 sps:$4 sm:$0xff]   ;;  %v5814_v41 = vld [vmem:[#allocation7 + $0x214] ss:$8 sps:$4 sm:$0xff]  }
 0x74c   : > { %v5817_v42 = vld [vmem:[#allocation7 + $0x314] ss:$8 sps:$4 sm:$0xff]  }
 0x74e   : > { %4591 = vmatpush2.bf16.msra.mxu0 %v5764_v43  ;;  %4632 = vmatpush2.bf16.msra.mxu1 %v5767_v44  ;;  %v5812_v43 = vld [vmem:[#allocation7 + $0x210] ss:$8 sps:$4 sm:$0xff]  }
 0x74f   : > { %4592 = vmatprep.subr.bf16.mxu0 %v5772_v26  ;;  %4633 = vmatprep.subr.bf16.mxu1 %v5775_v45  ;;  %v5815_v44 = vld [vmem:[#allocation7 + $0x310] ss:$8 sps:$4 sm:$0xff]   ;;  %v5820_v26 = vld [vmem:[#allocation7 + $0x204] ss:$8 sps:$4 sm:$0xff]  }
 0x750   : > { %v5823_v45 = vld [vmem:[#allocation7 + $0x304] ss:$8 sps:$4 sm:$0xff]  }
 0x752   : > { %4593 = vmatpush2.bf16.msra.mxu0 %v5770_v46  ;;  %4634 = vmatpush2.bf16.msra.mxu1 %v5773_v47  ;;  %v5818_v46 = vld [vmem:[#allocation7 + $0x200] ss:$8 sps:$4 sm:$0xff]  }
 0x753   : > { %4644 = vmatprep.subr.bf16.mxu0 %v5778_v48  ;;  %4685 = vmatprep.subr.bf16.mxu1 %v5781_v49  ;;  %v5821_v47 = vld [vmem:[#allocation7 + $0x300] ss:$8 sps:$4 sm:$0xff]   ;;  %v5826_v48 = vld [vmem:[#allocation7 + $0x2f4] ss:$8 sps:$4 sm:$0xff]  }
 0x754   : > { %v5829_v49 = vld [vmem:[#allocation7 + $0x3f4] ss:$8 sps:$4 sm:$0xff]  }
 0x795   : > { %v3636_v57 = vpop.f32.mrf.mxu0  ;;  %v3677_v58 = vpop.f32.mrf.mxu1 }
 0x796   : > { %v3637_v55 = vadd.f32 %v3636_v57, %v2925_v51  ;;  %v3678_v61 = vadd.f32 %v3677_v58, %v2933_v52  ;;  %v5824_v51 = vld [vmem:[#allocation7 + $0x2f0] ss:$8 sps:$4 sm:$0xff]   ;;  %v5830_v57 = vld [vmem:[#allocation7 + $0x2e0] ss:$8 sps:$4 sm:$0xff]  }
 0x797   : > { %v3638_v62 = vpop.f32.mrf.mxu0  ;;  %v3679_v0 = vpop.f32.mrf.mxu1  ;;  %v5827_v52 = vld [vmem:[#allocation7 + $0x3f0] ss:$8 sps:$4 sm:$0xff]   ;;  %v5833_v58 = vld [vmem:[#allocation7 + $0x3e0] ss:$8 sps:$4 sm:$0xff]  }
 0x798   : > { %v3639_v59 = vadd.f32 %v3638_v62, %v2929_v56  ;;  %v3680_v1 = vadd.f32 %v3679_v0, %v2937_v5  ;;  %v3766_v10 = vmax.f32 %v3637_v55, 0.0  ;;  %v3768_v11 = vmax.f32 %v3678_v61, 0.0  ;;  %v5832_v56 = vld [vmem:[#allocation7 + $0x2e4] ss:$8 sps:$4 sm:$0xff]   ;;  %v5838_v55 = vld [vmem:[#allocation7 + $0x2d4] ss:$8 sps:$4 sm:$0xff]  }
 0x799   : > { %v3640_v12 = vpop.f32.mrf.mxu0  ;;  %v3681_v13 = vpop.f32.mrf.mxu1  ;;  %v5835_v5 = vld [vmem:[#allocation7 + $0x3e4] ss:$8 sps:$4 sm:$0xff]   ;;  %v5841_v61 = vld [vmem:[#allocation7 + $0x3d4] ss:$8 sps:$4 sm:$0xff]   ;;  %v5836_v62 = vld [vmem:[#allocation7 + $0x2d0] ss:$8 sps:$4 sm:$0xff]  }
 0x79a   : > { %v3767_v7 = vmax.f32 %v3639_v59, 0.0  ;;  %v3769_v14 = vmax.f32 %v3680_v1, 0.0  ;;  %v3774_v34 = vpack.c.bf16 %v3766_v10, %v3766_v10  ;;  %v3776_v35 = vpack.c.bf16 %v3768_v11, %v3768_v11  ;;  %v5839_v0 = vld [vmem:[#allocation7 + $0x3d0] ss:$8 sps:$4 sm:$0xff]   ;;  %v5844_v59 = vld [vmem:[#allocation7 + $0x2c4] ss:$8 sps:$4 sm:$0xff]  }
 0x79b   : > { %v3641_v15 = vpop.f32.mrf.mxu0  ;;  %v3682_v16 = vpop.f32.mrf.mxu1  ;;  %v5847_v1 = vld [vmem:[#allocation7 + $0x3c4] ss:$8 sps:$4 sm:$0xff]   ;;  %v5842_v10 = vld [vmem:[#allocation7 + $0x2c0] ss:$8 sps:$4 sm:$0xff]   ;;  %v5850_v12 = vld [vmem:[#allocation7 + $0x2b4] ss:$8 sps:$4 sm:$0xff]  }
 0x79c   : > { %v3775_v8 = vpack.c.bf16 %v3767_v7, %v3767_v7  ;;  %v3777_v54 = vpack.c.bf16 %v3769_v14, %v3769_v14  ;;  %v5845_v11 = vld [vmem:[#allocation7 + $0x3c0] ss:$8 sps:$4 sm:$0xff]   ;;  %v5853_v13 = vld [vmem:[#allocation7 + $0x3b4] ss:$8 sps:$4 sm:$0xff]   ;;  %v5848_v7 = vld [vmem:[#allocation7 + $0x2b0] ss:$8 sps:$4 sm:$0xff]  }
 0x79d   : > { %v5851_v14 = vld [vmem:[#allocation7 + $0x3b0] ss:$8 sps:$4 sm:$0xff]   ;;  %v5856_v15 = vld [vmem:[#allocation7 + $0x2a4] ss:$8 sps:$4 sm:$0xff]  }
 0x79e   : > { %4594 = vmatprep.mubr.bf16.mxu0 %v3775_v8  ;;  %4635 = vmatprep.mubr.bf16.mxu1 %v3777_v54  ;;  %v5859_v16 = vld [vmem:[#allocation7 + $0x3a4] ss:$8 sps:$4 sm:$0xff]   ;;  %v2948_v8 = vsub.s32 6, %v6228_v6  ;;  %v5854_v54 = vld [vmem:[#allocation7 + $0x2a0] ss:$8 sps:$4 sm:$0xff]  }
 0x79f   : > { %4595 = vmatmul.mubr.bf16.vlgmr.msra.gmra.mxu0 %v3774_v34  ;;  %4636 = vmatmul.mubr.bf16.vlgmr.msra.gmra.mxu1 %v3776_v35  ;;  %v5862_v34 = vld [vmem:[#allocation7 + $0x294] ss:$8 sps:$4 sm:$0xff]  }
 0x7a0   : > { %4645 = vmatpush1.bf16.msra.mxu0 %v5776_v17  ;;  %4686 = vmatpush1.bf16.msra.mxu1 %v5779_v22  ;;  %v5857_v17 = vld [vmem:[#allocation7 + $0x3a0] ss:$8 sps:$4 sm:$0xff]   ;;  %v2952_v22 = vsub.s32 7, %v6228_v6  ;;  %v5865_v35 = vld [vmem:[#allocation7 + $0x394] ss:$8 sps:$4 sm:$0xff]  }
 0x7a1   : > { %4646 = vmatprep.subr.bf16.mxu0 %v5784_v18  ;;  %4687 = vmatprep.subr.bf16.mxu1 %v5787_v20  ;;  %v2941_v18 = vrot.slane %v6511_v50, %v621_v53  ;;  %v2949_v20 = vrot.slane %v6511_v50, %v2948_v8  ;;  %v5866_v6 = vld [vmem:[#allocation7 + $0x280] ss:$8 sps:$4 sm:$0xff]  }
 0x7a4   : > { %4647 = vmatpush1.bf16.msra.mxu0 %v5782_v3  ;;  %4688 = vmatpush1.bf16.msra.mxu1 %v5785_v21  ;;  %v2945_v3 = vrot.slane %v6511_v50, %v625_v60  ;;  %v2953_v21 = vrot.slane %v6511_v50, %v2952_v22  ;;  %v5869_v60 = vld [vmem:[#allocation7 + $0x380] ss:$8 sps:$4 sm:$0xff]  }
 0x7a5   : > { %4648 = vmatprep.subr.bf16.mxu0 %v5790_v24  ;;  %4689 = vmatprep.subr.bf16.mxu1 %v5793_v25  ;;  %v5860_v24 = vld [vmem:[#allocation7 + $0x290] ss:$8 sps:$4 sm:$0xff]  }
 0x7a6   : > { %v5863_v25 = vld [vmem:[#allocation7 + $0x390] ss:$8 sps:$4 sm:$0xff]  }
 0x7a8   : > { %4649 = vmatpush1.bf16.msra.mxu0 %v5788_v28  ;;  %4690 = vmatpush1.bf16.msra.mxu1 %v5791_v27 }
 0x7a9   : > { %4650 = vmatprep.subr.bf16.mxu0 %v5796_v29  ;;  %4691 = vmatprep.subr.bf16.mxu1 %v5799_v32  ;;  %v5868_v29 = vld [vmem:[#allocation7 + $0x284] ss:$8 sps:$4 sm:$0xff]  }
 0x7aa   : > { %v5871_v32 = vld [vmem:[#allocation7 + $0x384] ss:$8 sps:$4 sm:$0xff]  }
 0x7ac   : > { %4651 = vmatpush1.bf16.msra.mxu0 %v5794_v4  ;;  %4692 = vmatpush1.bf16.msra.mxu1 %v5797_v2 }
 0x7ad   : > { %4652 = vmatprep.subr.bf16.mxu0 %v5802_v33  ;;  %4693 = vmatprep.subr.bf16.mxu1 %v5805_v30 }
 0x7b0   : > { %4653 = vmatpush1.bf16.msra.mxu0 %v5800_v36  ;;  %4694 = vmatpush1.bf16.msra.mxu1 %v5803_v37 }
 0x7b1   : > { %4654 = vmatprep.subr.bf16.mxu0 %v5808_v31  ;;  %4695 = vmatprep.subr.bf16.mxu1 %v5811_v38 }
 0x7b4   : > { %4655 = vmatpush1.bf16.msra.mxu0 %v5806_v39  ;;  %4696 = vmatpush1.bf16.msra.mxu1 %v5809_v40 }
 0x7b5   : > { %4656 = vmatprep.subr.bf16.mxu0 %v5814_v41  ;;  %4697 = vmatprep.subr.bf16.mxu1 %v5817_v42 }
 0x7b8   : > { %4657 = vmatpush1.bf16.msra.mxu0 %v5812_v43  ;;  %4698 = vmatpush1.bf16.msra.mxu1 %v5815_v44 }
 0x7b9   : > { %4658 = vmatprep.subr.bf16.mxu0 %v5820_v26  ;;  %4699 = vmatprep.subr.bf16.mxu1 %v5823_v45 }
 0x7bc   : > { %4659 = vmatpush1.bf16.msra.mxu0 %v5818_v46  ;;  %4700 = vmatpush1.bf16.msra.mxu1 %v5821_v47 }
 0x7bd   : > { %4660 = vmatprep.subr.bf16.mxu0 %v5826_v48  ;;  %4701 = vmatprep.subr.bf16.mxu1 %v5829_v49 }
 0x7c0   : > { %4661 = vmatpush2.bf16.msra.mxu0 %v5824_v51  ;;  %4702 = vmatpush2.bf16.msra.mxu1 %v5827_v52 }
 0x7c1   : > { %4662 = vmatprep.subr.bf16.mxu0 %v5832_v56  ;;  %4703 = vmatprep.subr.bf16.mxu1 %v5835_v5 }
 0x7c4   : > { %4663 = vmatpush2.bf16.msra.mxu0 %v5830_v57  ;;  %4704 = vmatpush2.bf16.msra.mxu1 %v5833_v58  ;;  %v3910_v57 = vld [vmem:[%s6568_s10] sm:$0x3] }
 0x7c5   : > { %4664 = vmatprep.subr.bf16.mxu0 %v5838_v55  ;;  %4705 = vmatprep.subr.bf16.mxu1 %v5841_v61  ;;  %v3915_v58 = vrot.slane %v3910_v57, %v6237_v9  ;;  %v3919_v55 = vrot.slane %v3910_v57, %v6248_v23 }
 0x7c8   : > { %4665 = vmatpush2.bf16.msra.mxu0 %v5836_v62  ;;  %4706 = vmatpush2.bf16.msra.mxu1 %v5839_v0 }
 0x7c9   : > { %4666 = vmatprep.subr.bf16.mxu0 %v5844_v59  ;;  %4707 = vmatprep.subr.bf16.mxu1 %v5847_v1 }
 0x7cc   : > { %4667 = vmatpush2.bf16.msra.mxu0 %v5842_v10  ;;  %4708 = vmatpush2.bf16.msra.mxu1 %v5845_v11 }
 0x7cd   : > { %4668 = vmatprep.subr.bf16.mxu0 %v5850_v12  ;;  %4709 = vmatprep.subr.bf16.mxu1 %v5853_v13 }
 0x7d0   : > { %4669 = vmatpush2.bf16.msra.mxu0 %v5848_v7  ;;  %4710 = vmatpush2.bf16.msra.mxu1 %v5851_v14 }
 0x7d1   : > { %4670 = vmatprep.subr.bf16.mxu0 %v5856_v15  ;;  %4711 = vmatprep.subr.bf16.mxu1 %v5859_v16 }
 0x7d4   : > { %4671 = vmatpush2.bf16.msra.mxu0 %v5854_v54  ;;  %4712 = vmatpush2.bf16.msra.mxu1 %v5857_v17 }
 0x7d5   : > { %v3718_v28 = vpop.f32.mrf.mxu0  ;;  %v3759_v27 = vpop.f32.mrf.mxu1  ;;  %4672 = vmatprep.subr.bf16.mxu0 %v5862_v34  ;;  %4713 = vmatprep.subr.bf16.mxu1 %v5865_v35 }
 0x7d6   : > { %v3719_v4 = vadd.f32 %v3718_v28, %v2941_v18  ;;  %v3760_v53 = vadd.f32 %v3759_v27, %v2949_v20 }
 0x7d7   : > { %v3720_v2 = vpop.f32.mrf.mxu0  ;;  %v3761_v33 = vpop.f32.mrf.mxu1 }
 0x7d8   : > { %v3721_v30 = vadd.f32 %v3720_v2, %v2945_v3  ;;  %v3762_v36 = vadd.f32 %v3761_v33, %v2953_v21  ;;  %4673 = vmatpush2.bf16.msra.mxu0 %v5860_v24  ;;  %4714 = vmatpush2.bf16.msra.mxu1 %v5863_v25  ;;  %v3770_v37 = vmax.f32 %v3719_v4, 0.0  ;;  %v3772_v50 = vmax.f32 %v3760_v53, 0.0 }
 0x7d9   : > { %v3722_v31 = vpop.f32.mrf.mxu0  ;;  %v3763_v38 = vpop.f32.mrf.mxu1  ;;  %4674 = vmatprep.subr.bf16.mxu0 %v5868_v29  ;;  %4715 = vmatprep.subr.bf16.mxu1 %v5871_v32 }
 0x7da   : > { %v3771_v39 = vmax.f32 %v3721_v30, 0.0  ;;  %v3773_v40 = vmax.f32 %v3762_v36, 0.0  ;;  %v3778_v26 = vpack.c.bf16 %v3770_v37, %v3770_v37  ;;  %v3780_v45 = vpack.c.bf16 %v3772_v50, %v3772_v50 }
 0x7db   : > { %v3723_v41 = vpop.f32.mrf.mxu0  ;;  %v3764_v42 = vpop.f32.mrf.mxu1 }
 0x7dc   : > { %v3779_v43 = vpack.c.bf16 %v3771_v39, %v3771_v39  ;;  %v3781_v44 = vpack.c.bf16 %v3773_v40, %v3773_v40  ;;  %4675 = vmatpush2.bf16.msra.mxu0 %v5866_v6  ;;  %4716 = vmatpush2.bf16.msra.mxu1 %v5869_v60 }
 0x7de   : > { %4676 = vmatprep.mubr.bf16.mxu0 %v3779_v43  ;;  %4717 = vmatprep.mubr.bf16.mxu1 %v3781_v44 }
 0x7df   : > { %4677 = vmatmul.mubr.bf16.vlgmr.msra.gmra.mxu0 %v3778_v26  ;;  %4718 = vmatmul.mubr.bf16.vlgmr.msra.gmra.mxu1 %v3780_v45 }
 0x85f   : > { %v4596_v46 = vpop.f32.mrf.mxu0  ;;  %v4637_v47 = vpop.f32.mrf.mxu1 }
 0x860   : > { %v4597_v61 = vadd.f32 %v4596_v46, %v3915_v58 }
 0x861   : > { %v4598_v48 = vpop.f32.mrf.mxu0  ;;  %v4639_v49 = vpop.f32.mrf.mxu1 }
 0x862   : > { %v4599_v62 = vadd.f32 %v4598_v48, %v3919_v55  ;;  %v4638_v0 = vadd.f32 %v4637_v47, %v4597_v61 }
 0x863   : > { %v4600_v51 = vpop.f32.mrf.mxu0  ;;  %v4641_v52 = vpop.f32.mrf.mxu1 }
 0x864   : > { %v4640_v10 = vadd.f32 %v4639_v49, %v4599_v62 }
 0x865   : > { %v4601_v56 = vpop.f32.mrf.mxu0  ;;  %v4642_v5 = vpop.f32.mrf.mxu1 }
 0x89f   : > { %v4678_v59 = vpop.f32.mrf.mxu0  ;;  %v4719_v1 = vpop.f32.mrf.mxu1 }
 0x8a0   : > { %v4679_v11 = vadd.f32 %v4678_v59, %v4638_v0 }
 0x8a1   : > { %v4680_v12 = vpop.f32.mrf.mxu0  ;;  %v4721_v13 = vpop.f32.mrf.mxu1 }
 0x8a2   : > { %v4720_v7 = vadd.f32 %v4719_v1, %v4679_v11  ;;  %v4681_v14 = vadd.f32 %v4680_v12, %v4640_v10 }
 0x8a3   : > { %v4682_v15 = vpop.f32.mrf.mxu0  ;;  %v4723_v16 = vpop.f32.mrf.mxu1 }
 0x8a4   : > { %v4722_v8 = vadd.f32 %v4721_v13, %v4681_v14  ;;  %v4726_v22 = vadd.f32 %v4720_v7, %v6496_v63  ;;  %v4744_v63 = vld [vmem:[%s6569_s11] sm:$0x3] }
 0x8a5   : > { %v4683_v54 = vpop.f32.mrf.mxu0  ;;  %v4724_v17 = vpop.f32.mrf.mxu1  ;;  %v4749_v4 = vrot.slane %v4744_v63, %v6237_v9  ;;  %v4753_v53 = vrot.slane %v4744_v63, %v6248_v23 }
 0x8a6   : > { %v4727_v34 = vadd.f32 %v4722_v8, %v6494_v19  ;;  %v4758_v19 = vld [vmem:[%s6570_s12] sm:$0x3] }
 0x8a7   : > { %v4763_v33 = vrot.slane %v4758_v19, %v6237_v9  ;;  %v4767_v30 = vrot.slane %v4758_v19, %v6248_v23 }
 0x8a8   : > { %v4728_v35 = vadd.f32 %v4727_v34, %v4726_v22 }
 0x8aa   : > { %4729 = vadd.xlane.f32.xlu0 %v4728_v35 }
 0x933   : > { %v4730_v18 = vpop.xlane.xlu0 %4729 }
 0x934   : > { %v4731_v20 = vmul.f32 0.00390625, %v4730_v18 }
 0x936   : > { %v4732_v3 = vsub.f32 %v4726_v22, %v4731_v20  ;;  %v4733_v21 = vsub.f32 %v4727_v34, %v4731_v20 }
 0x938   : > { %v4734_v24 = vmul.f32 %v4732_v3, %v4732_v3  ;;  %v4735_v25 = vmul.f32 %v4733_v21, %v4733_v21 }
 0x93a   : > { %v4736_v28 = vadd.f32 %v4735_v25, %v4734_v24 }
 0x93c   : > { %4737 = vadd.xlane.f32.xlu0 %v4736_v28 }
 0x9c5   : > { %v4738_v27 = vpop.xlane.xlu0 %4737 }
 0x9c6   : > { %v4739_v29 = vmul.f32 0.00390625, %v4738_v27 }
 0x9c8   : > { %v4740_v32 = vadd.f32 1e-05, %v4739_v29 }
 0x9ca   : > { %5906 = vrsqrt.f32 %v4740_v32 }
 0x9d7   : > { %v5907_v2 = vpop.eup %5906 }
 0x9d8   : > { %v4742_v36 = vmul.f32 %v5907_v2, %v4732_v3  ;;  %v4743_v6 = vmul.f32 %v5907_v2, %v4733_v21 }
 0x9da   : > { %v4756_v60 = vmul.f32 %v4749_v4, %v4742_v36  ;;  %v4757_v37 = vmul.f32 %v4753_v53, %v4743_v6 }
 0x9dc   : > { %v4770_v50 = vadd.f32 %v4763_v33, %v4756_v60  ;;  %v4771_v31 = vadd.f32 %v4767_v30, %v4757_v37 }
 0x9de   : > { %4772 = vst [vmem:[%s499_s24] sm:$0xff] %v4770_v50  ;;  %4773 = vst [vmem:[%s499_s24 + $0x8] sm:$0xff] %v4771_v31 }
 0x9df PF: > { %s26_s25 = sadd.s32 1, %s6032_s25  }
 0x9e0   : > { %p23_p3 = scmp.ge.s32.totalorder %s26_s25, 4  }
 0x9e2   :  { %25 = sbr.rel (!%p23_p3) target bundleno = 3 (0x3), region = 119 }
 0x9e7   :  { %4795 = vsyncpa [#allocation3], 1 }
 0x9e8   :  { %4797 = vsyncpa [#allocation3 + $0x1], 1 }
 0x9e9   :  { %4798 = vsyncpa [#allocation5], 1 }
 0x9ea   :  { %4799 = vsyncpa [#allocation8], 1 }

</bundles_post_ra>
